<compile_context>
chip_gen: v6e
topology: v6e:2x2x1
jax: 0.10.0
libtpu: 0.0.40
codegen_flags: <defaults>
</compile_context>

<pallas_src>
import functools

import jax
import jax.numpy as jnp
from jax import lax
from jax.experimental import pallas as pl
from jax.experimental.pallas import tpu as pltpu

_LANE = 128
_MAX_TILE_M = 2048   # conv1 tile cap (review: bigger tiles for large batches)
_MAX_TILE_B = 128    # conv2+MLP batch-tile cap


def _round_up(x, m):
    return (x + m - 1) // m * m


def _cdiv(a, b):
    return (a + b - 1) // b


# ----------------------------------------------------------------------------
# Kernel 1: conv1(1->6, k5, pad2) + bias + ReLU + 2x2 max-pool, fused.
# ----------------------------------------------------------------------------
def _conv1_pool_kernel(p_ref, w_ref, b_ref, o_ref, *, tile):
    """p_ref: (1, 25, 4*tile) bf16 im2col patches, columns ordered (pool-tap, pooled-position);
    w_ref: (6, 25) bf16; b_ref: (6, 1) f32; o_ref: (6, tile) bf16 (lane-dense store)."""
    z = jnp.dot(w_ref[...], p_ref[0], preferred_element_type=jnp.float32)   # (6, 4*tile)
    # tap-max: slices at 128-aligned lane offsets (tile is a multiple of 128).
    m = jnp.maximum(jnp.maximum(z[:, 0 * tile:1 * tile], z[:, 1 * tile:2 * tile]),
                    jnp.maximum(z[:, 2 * tile:3 * tile], z[:, 3 * tile:4 * tile]))
    o_ref[...] = jnp.maximum(m + b_ref[...], 0.0).astype(o_ref.dtype)


# ----------------------------------------------------------------------------
# Kernel 2: conv2(6->16, k5) + bias + ReLU + pool + fc1 + fc2 + fc3, fused.
# ----------------------------------------------------------------------------
def _conv2_mlp_kernel(p_ref, cw_ref, cb_ref, w1_ref, b1_ref, w2_ref, b2_ref,
                      w3_ref, b3_ref, o_ref, *, tb):
    """p_ref: (1, 4, 150, 25*tb) bf16 conv2 patches for tb batch samples (columns = s*tb + b);
    cw/cb: conv2 weights; w1/b1, w2/b2, w3/b3: fc weights padded to 128-wide; o_ref: (1, 10, tb) f32."""
    cw = cw_ref[...]                                                        # (16, 150)
    z = jnp.dot(cw, p_ref[0, 0], preferred_element_type=jnp.float32)
    for t in range(1, 4):
        z = jnp.maximum(z, jnp.dot(cw, p_ref[0, t], preferred_element_type=jnp.float32))
    y2 = jnp.maximum(z + cb_ref[...], 0.0)                                  # (16, 25*tb) f32
    # Flatten (spatial, channel) -> feature rows; fc1 columns were permuted to (s, co) at prep.
    feats = jnp.concatenate([y2[:, s * tb:(s + 1) * tb] for s in range(25)], axis=0)  # (400, tb)
    feats = feats.astype(jnp.bfloat16)
    h = jnp.dot(w1_ref[...], feats, preferred_element_type=jnp.float32) + b1_ref[...]
    h = jnp.maximum(h, 0.0).astype(jnp.bfloat16)                            # (128, tb)
    h = jnp.dot(w2_ref[...], h, preferred_element_type=jnp.float32) + b2_ref[...]
    h = jnp.maximum(h, 0.0).astype(jnp.bfloat16)                            # (128, tb)
    logits = jnp.dot(w3_ref[...], h, preferred_element_type=jnp.float32) + b3_ref[...]
    o_ref[0] = logits.astype(o_ref.dtype)                                   # (10, tb)


# ----------------------------------------------------------------------------
# Pallas wrappers
# ----------------------------------------------------------------------------
def conv1_pool_pallas(patches, w, b):
    """patches: (4, 25, M) bf16 -> pooled conv1 activations (6, M) bf16."""
    _, K, M = patches.shape
    n_out = w.shape[0]
    m128 = _round_up(M, _LANE)
    # >= 2 tiles whenever possible (v7x megacore), tiles up to _MAX_TILE_M lanes.
    tile = max(_LANE, min(_MAX_TILE_M, _round_up(_cdiv(m128, 2), _LANE)))
    m_pad = _round_up(M, tile)
    if m_pad != M:
        patches = jnp.pad(patches, ((0, 0), (0, 0), (0, m_pad - M)))
    nt = m_pad // tile
    # Fold the 4 pool taps into the lane dim of each tile -> single dot per tile.
    p = patches.reshape(4, K, nt, tile).transpose(2, 1, 0, 3).reshape(nt, K, 4 * tile)
    out = pl.pallas_call(
        functools.partial(_conv1_pool_kernel, tile=tile),
        out_shape=jax.ShapeDtypeStruct((n_out, m_pad), jnp.bfloat16),
        grid=(nt,),
        in_specs=[
            pl.BlockSpec((1, K, 4 * tile), lambda i: (i, 0, 0)),
            pl.BlockSpec((n_out, K), lambda i: (0, 0)),
            pl.BlockSpec((n_out, 1), lambda i: (0, 0)),
        ],
        out_specs=pl.BlockSpec((n_out, tile), lambda i: (0, i)),
        compiler_params=pltpu.CompilerParams(dimension_semantics=("parallel",)),
    )(p, w, b)
    return out[:, :M]


def conv2_mlp_pallas(p2, kp, *, ntiles, tb):
    """p2: (ntiles, 4, 150, 25*tb) bf16 -> logits (ntiles, 10, tb) f32."""
    return pl.pallas_call(
        functools.partial(_conv2_mlp_kernel, tb=tb),
        out_shape=jax.ShapeDtypeStruct((ntiles, 10, tb), jnp.float32),
        grid=(ntiles,),
        in_specs=[
            pl.BlockSpec((1, 4, 150, 25 * tb), lambda i: (i, 0, 0, 0)),
            pl.BlockSpec((16, 150), lambda i: (0, 0)),
            pl.BlockSpec((16, 1), lambda i: (0, 0)),
            pl.BlockSpec((128, 400), lambda i: (0, 0)),
            pl.BlockSpec((128, 1), lambda i: (0, 0)),
            pl.BlockSpec((128, 128), lambda i: (0, 0)),
            pl.BlockSpec((128, 1), lambda i: (0, 0)),
            pl.BlockSpec((10, 128), lambda i: (0, 0)),
            pl.BlockSpec((10, 1), lambda i: (0, 0)),
        ],
        out_specs=pl.BlockSpec((1, 10, tb), lambda i: (i, 0, 0)),
        compiler_params=pltpu.CompilerParams(dimension_semantics=("parallel",)),
    )(p2, kp["conv2_w"], kp["conv2_b"], kp["fc1_w"], kp["fc1_b"],
      kp["fc2_w"], kp["fc2_b"], kp["fc3_w"], kp["fc3_b"])


# ----------------------------------------------------------------------------
# XLA glue: pool-tap-grouped im2col (runs fused under jit, bf16)
# ----------------------------------------------------------------------------
def _conv1_patches(xp, B):
    """xp: (B, 32, 32) bf16 (input pre-padded by 2) -> (4, 25, B*196) bf16.
    Rows ordered (ki, kj); columns ordered (b, io, jo) pooled positions."""
    taps = []
    for ti in range(2):
        for tj in range(2):
            rows = []
            for ki in range(5):
                for kj in range(5):
                    r0, c0 = ti + ki, tj + kj
                    rows.append(xp[:, r0:r0 + 27:2, c0:c0 + 27:2].reshape(B * 196))
            taps.append(jnp.stack(rows, axis=0))           # (25, B*196)
    return jnp.stack(taps, axis=0)                          # (4, 25, B*196)


def _conv2_patches(y1r, ntiles, tb):
    """y1r: (6, B_pad, 14, 14) bf16 channel-major (no batch-major transpose needed)
    -> (ntiles, 4, 150, 25*tb) bf16; rows (ci, ki, kj) match conv2_w.reshape(16, 150)."""
    taps = []
    for ti in range(2):
        for tj in range(2):
            cols = []
            for ki in range(5):
                for kj in range(5):
                    r0, c0 = ti + ki, tj + kj
                    cols.append(y1r[:, :, r0:r0 + 9:2, c0:c0 + 9:2])   # (6, B_pad, 5, 5)
            t = jnp.stack(cols, axis=1)                     # (6, 25, B_pad, 5, 5)
            t = t.reshape(150, ntiles, tb, 25)              # (k, tile, b, s)
            t = t.transpose(1, 0, 3, 2)                     # (tile, k, s, b)
            taps.append(t.reshape(ntiles, 150, 25 * tb))
    return jnp.stack(taps, axis=1)                          # (ntiles, 4, 150, 25*tb)


# ----------------------------------------------------------------------------
# Parameters
# ----------------------------------------------------------------------------
def init_lenet_params(key):
    """PyTorch-layout f32 parameters (uniform(-1/sqrt(fan_in), 1/sqrt(fan_in)) like nn defaults)."""
    def uinit(k, shape, fan_in):
        bound = 1.0 / jnp.sqrt(jnp.float32(fan_in))
        return jax.random.uniform(k, shape, jnp.float32, -bound, bound)

    ks = jax.random.split(key, 10)
    return {
        "conv1_w": uinit(ks[0], (6, 1, 5, 5), 25),
        "conv1_b": uinit(ks[1], (6,), 25),
        "conv2_w": uinit(ks[2], (16, 6, 5, 5), 150),
        "conv2_b": uinit(ks[3], (16,), 150),
        "fc1_w": uinit(ks[4], (120, 400), 400),
        "fc1_b": uinit(ks[5], (120,), 400),
        "fc2_w": uinit(ks[6], (84, 120), 120),
        "fc2_b": uinit(ks[7], (84,), 120),
        "fc3_w": uinit(ks[8], (10, 84), 84),
        "fc3_b": uinit(ks[9], (10,), 84),
    }


def prepare_params(params):
    """One-time prep: flatten conv weights, permute fc1 columns to the kernel's (s, co) feature
    order, zero-pad fc widths 120/84 -> 128 (lane-dense MLP), cast MXU operands to bf16."""
    f32, bf16 = jnp.float32, jnp.bfloat16
    # fc1: torch feature index is co*25 + s; kernel feats rows are s*16 + co.
    w1 = params["fc1_w"].reshape(120, 16, 25).transpose(0, 2, 1).reshape(120, 400)
    w1 = jnp.pad(w1, ((0, 8), (0, 0)))                          # (128, 400)
    b1 = jnp.pad(params["fc1_b"], (0, 8)).reshape(128, 1)
    w2 = jnp.pad(params["fc2_w"], ((0, 44), (0, 8)))            # (128, 128)
    b2 = jnp.pad(params["fc2_b"], (0, 44)).reshape(128, 1)
    w3 = jnp.pad(params["fc3_w"], ((0, 0), (0, 44)))            # (10, 128)
    b3 = params["fc3_b"].reshape(10, 1)
    return {
        "conv1_w": params["conv1_w"].reshape(6, 25).astype(bf16),
        "conv1_b": params["conv1_b"].reshape(6, 1).astype(f32),
        "conv2_w": params["conv2_w"].reshape(16, 150).astype(bf16),
        "conv2_b": params["conv2_b"].reshape(16, 1).astype(f32),
        "fc1_w": w1.astype(bf16), "fc1_b": b1.astype(f32),
        "fc2_w": w2.astype(bf16), "fc2_b": b2.astype(f32),
        "fc3_w": w3.astype(bf16), "fc3_b": b3.astype(f32),
    }


# ----------------------------------------------------------------------------
# Forward pass
# ----------------------------------------------------------------------------
@jax.jit
def lenet_forward(kparams, x):
    """x: (B, 1, 28, 28) f32 NCHW -> logits (B, 10) f32."""
    B = x.shape[0]
    xb = x.astype(jnp.bfloat16).reshape(B, 28, 28)
    xp = jnp.pad(xb, ((0, 0), (2, 2), (2, 2)))                          # (B, 32, 32)
    # conv1 + ReLU + pool1 fused (kernel 1), output lane-dense channel-major bf16.
    p1 = _conv1_patches(xp, B)                                          # (4, 25, B*196)
    y1 = conv1_pool_pallas(p1, kparams["conv1_w"], kparams["conv1_b"])  # (6, B*196) bf16
    # conv2 + ReLU + pool2 + fc1/fc2/fc3 fused (kernel 2), gridded over >= 2 batch tiles.
    tb = max(1, min(_MAX_TILE_B, _cdiv(B, 2)))
    ntiles = _cdiv(B, tb)
    b_pad = ntiles * tb
    y1r = y1.reshape(6, B, 14, 14)                                      # free reshape, stays C-major
    if b_pad != B:
        y1r = jnp.pad(y1r, ((0, 0), (0, b_pad - B), (0, 0), (0, 0)))
    p2 = _conv2_patches(y1r, ntiles, tb)                                # (ntiles, 4, 150, 25*tb)
    out = conv2_mlp_pallas(p2, kparams, ntiles=ntiles, tb=tb)           # (ntiles, 10, tb) f32
    return out.transpose(0, 2, 1).reshape(b_pad, 10)[:B]


# ----------------------------------------------------------------------------
# Plain-JAX reference (same bf16-input / f32-accumulate precision as the kernels)
# ----------------------------------------------------------------------------
def lenet_reference(params, x):
    def conv(h, w, b, pad):
        y = lax.conv_general_dilated(
            h.astype(jnp.bfloat16), w.astype(jnp.bfloat16), (1, 1),
            ((pad, pad), (pad, pad)), dimension_numbers=("NCHW", "OIHW", "NCHW"),
            preferred_element_type=jnp.float32)
        return y + b.reshape(1, -1, 1, 1)

    def pool(y):
        return jnp.maximum(jnp.maximum(y[:, :, 0::2, 0::2], y[:, :, 0::2, 1::2]),
                           jnp.maximum(y[:, :, 1::2, 0::2], y[:, :, 1::2, 1::2]))

    def dense(h, w, b, relu):
        y = jnp.dot(h.astype(jnp.bfloat16), w.T.astype(jnp.bfloat16),
                    preferred_element_type=jnp.float32) + b
        return jnp.maximum(y, 0.0) if relu else y

    h = pool(jnp.maximum(conv(x, params["conv1_w"], params["conv1_b"], 2), 0.0))
    h = pool(jnp.maximum(conv(h, params["conv2_w"], params["conv2_b"], 0), 0.0))
    h = h.reshape(h.shape[0], -1)
    h = dense(h, params["fc1_w"], params["fc1_b"], True)
    h = dense(h, params["fc2_w"], params["fc2_b"], True)
    return dense(h, params["fc3_w"], params["fc3_b"], False)


if __name__ == "__main__":
    key = jax.random.PRNGKey(0)
    pkey, xkey = jax.random.split(key)
    params = init_lenet_params(pkey)
    kparams = prepare_params(params)
    # LeNet forward implies 1-channel 28x28 input (16*5*5 flatten); batch=2.
    x = jax.random.normal(xkey, (2, 1, 28, 28), dtype=jnp.float32)
    out = jax.block_until_ready(lenet_forward(kparams, x))
    assert out.shape == (2, 10) and out.dtype == jnp.float32
    ref = lenet_reference(params, x)
    max_err = float(jnp.max(jnp.abs(out - ref)))
    assert max_err < 5e-2, f"kernel vs reference max abs diff {max_err}"
    print("KERNEL_OK")
</pallas_src>

<mosaic_0001>
module attributes {stable_mosaic.version = 11 : i64} {
  func.func @_conv1_pool_kernel(%arg0: i32, %arg1: memref<1x25x1024xbf16, #tpu.memory_space<vmem>>, %arg2: memref<6x25xbf16, #tpu.memory_space<vmem>>, %arg3: memref<6x1xf32, #tpu.memory_space<vmem>>, %arg4: memref<6x256xbf16, #tpu.memory_space<vmem>>) attributes {dimension_semantics = [#tpu.dimension_semantics<parallel>], iteration_bounds = array<i64: 2>, scalar_prefetch = 0 : i64, scratch_operands = 0 : i64, tpu.core_type = #tpu.core_type<tc>, window_params = [{transform_indices = @transform_0, window_bounds = array<i64: 1, 25, 1024>}, {pipeline_mode = #tpu.pipeline_mode<synchronous>, transform_indices = @transform_1, window_bounds = array<i64: 6, 25>}, {pipeline_mode = #tpu.pipeline_mode<synchronous>, transform_indices = @transform_2, window_bounds = array<i64: 6, 1>}, {transform_indices = @transform_3, window_bounds = array<i64: 6, 256>}]} {
    %c0 = arith.constant 0 : index
    %c0_0 = arith.constant 0 : index
    %0 = vector.load %arg2[%c0, %c0_0] : memref<6x25xbf16, #tpu.memory_space<vmem>>, vector<6x25xbf16>
    %c0_1 = arith.constant 0 : index
    %c0_2 = arith.constant 0 : index
    %c0_3 = arith.constant 0 : index
    %1 = vector.load %arg1[%c0_1, %c0_2, %c0_3] : memref<1x25x1024xbf16, #tpu.memory_space<vmem>>, vector<1x25x1024xbf16>
    %2 = vector.shape_cast %1 : vector<1x25x1024xbf16> to vector<25x1024xbf16>
    %cst = arith.constant dense<0.000000e+00> : vector<6x1024xf32>
    %3 = tpu.matmul %0, %2, %cst {dimension_numbers = #tpu.dot_dimension_numbers<[1], [0], [0], [1], [0, 0, 1, 1], [], []>} : vector<6x25xbf16>, vector<25x1024xbf16>, vector<6x1024xf32> -> vector<6x1024xf32>
    %4 = vector.extract_strided_slice %3 {offsets = [0, 0], sizes = [6, 256], strides = [1, 1]} : vector<6x1024xf32> to vector<6x256xf32>
    %5 = vector.extract_strided_slice %3 {offsets = [0, 256], sizes = [6, 256], strides = [1, 1]} : vector<6x1024xf32> to vector<6x256xf32>
    %6 = arith.maximumf %4, %5 : vector<6x256xf32>
    %7 = vector.extract_strided_slice %3 {offsets = [0, 512], sizes = [6, 256], strides = [1, 1]} : vector<6x1024xf32> to vector<6x256xf32>
    %8 = vector.extract_strided_slice %3 {offsets = [0, 768], sizes = [6, 256], strides = [1, 1]} : vector<6x1024xf32> to vector<6x256xf32>
    %9 = arith.maximumf %7, %8 : vector<6x256xf32>
    %10 = arith.maximumf %6, %9 : vector<6x256xf32>
    %c0_4 = arith.constant 0 : index
    %c0_5 = arith.constant 0 : index
    %11 = vector.load %arg3[%c0_4, %c0_5] : memref<6x1xf32, #tpu.memory_space<vmem>>, vector<6x1xf32>
    %12 = vector.broadcast %11 : vector<6x1xf32> to vector<6x256xf32>
    %13 = arith.addf %10, %12 : vector<6x256xf32>
    %cst_6 = arith.constant 0.000000e+00 : f32
    %14 = vector.broadcast %cst_6 : f32 to vector<6x256xf32>
    %15 = arith.maximumf %13, %14 : vector<6x256xf32>
    %16 = arith.truncf %15 : vector<6x256xf32> to vector<6x256xbf16>
    %c0_7 = arith.constant 0 : index
    %c0_8 = arith.constant 0 : index
    %17 = vector.load %arg4[%c0_7, %c0_8] : memref<6x256xbf16, #tpu.memory_space<vmem>>, vector<6x256xbf16>
    tpu.vector_store %arg4[%c0_7, %c0_8], %16 {strides = array<i32>} : memref<6x256xbf16, #tpu.memory_space<vmem>>, vector<6x256xbf16>,
    return
  }
  func.func @transform_0(%arg0: i32) -> (i32, i32, i32) {
    %c0_i32 = arith.constant 0 : i32
    %c0_i32_0 = arith.constant 0 : i32
    %c0_i32_1 = arith.constant 0 : i32
    return %arg0, %c0_i32, %c0_i32_0 : i32, i32, i32
  }
  func.func @transform_1(%arg0: i32) -> (i32, i32) {
    %c0_i32 = arith.constant 0 : i32
    %c0_i32_0 = arith.constant 0 : i32
    %c0_i32_1 = arith.constant 0 : i32
    return %c0_i32, %c0_i32_0 : i32, i32
  }
  func.func @transform_2(%arg0: i32) -> (i32, i32) {
    %c0_i32 = arith.constant 0 : i32
    %c0_i32_0 = arith.constant 0 : i32
    %c0_i32_1 = arith.constant 0 : i32
    return %c0_i32, %c0_i32_0 : i32, i32
  }
  func.func @transform_3(%arg0: i32) -> (i32, i32) {
    %c0_i32 = arith.constant 0 : i32
    %c0_i32_0 = arith.constant 0 : i32
    return %c0_i32, %arg0 : i32, i32
  }
}

module attributes {stable_mosaic.version = 11 : i64} {
  func.func @_conv2_mlp_kernel(%arg0: i32, %arg1: memref<1x4x150x25xbf16, #tpu.memory_space<vmem>>, %arg2: memref<16x150xbf16, #tpu.memory_space<vmem>>, %arg3: memref<16x1xf32, #tpu.memory_space<vmem>>, %arg4: memref<128x400xbf16, #tpu.memory_space<vmem>>, %arg5: memref<128x1xf32, #tpu.memory_space<vmem>>, %arg6: memref<128x128xbf16, #tpu.memory_space<vmem>>, %arg7: memref<128x1xf32, #tpu.memory_space<vmem>>, %arg8: memref<10x128xbf16, #tpu.memory_space<vmem>>, %arg9: memref<10x1xf32, #tpu.memory_space<vmem>>, %arg10: memref<1x10x1xf32, #tpu.memory_space<vmem>>) attributes {dimension_semantics = [#tpu.dimension_semantics<parallel>], iteration_bounds = array<i64: 2>, scalar_prefetch = 0 : i64, scratch_operands = 0 : i64, tpu.core_type = #tpu.core_type<tc>, window_params = [{transform_indices = @transform_0, window_bounds = array<i64: 1, 4, 150, 25>}, {pipeline_mode = #tpu.pipeline_mode<synchronous>, transform_indices = @transform_1, window_bounds = array<i64: 16, 150>}, {pipeline_mode = #tpu.pipeline_mode<synchronous>, transform_indices = @transform_2, window_bounds = array<i64: 16, 1>}, {pipeline_mode = #tpu.pipeline_mode<synchronous>, transform_indices = @transform_3, window_bounds = array<i64: 128, 400>}, {pipeline_mode = #tpu.pipeline_mode<synchronous>, transform_indices = @transform_4, window_bounds = array<i64: 128, 1>}, {pipeline_mode = #tpu.pipeline_mode<synchronous>, transform_indices = @transform_5, window_bounds = array<i64: 128, 128>}, {pipeline_mode = #tpu.pipeline_mode<synchronous>, transform_indices = @transform_6, window_bounds = array<i64: 128, 1>}, {pipeline_mode = #tpu.pipeline_mode<synchronous>, transform_indices = @transform_7, window_bounds = array<i64: 10, 128>}, {pipeline_mode = #tpu.pipeline_mode<synchronous>, transform_indices = @transform_8, window_bounds = array<i64: 10, 1>}, {transform_indices = @transform_9, window_bounds = array<i64: 1, 10, 1>}]} {
    %c0 = arith.constant 0 : index
    %c0_0 = arith.constant 0 : index
    %0 = vector.load %arg2[%c0, %c0_0] : memref<16x150xbf16, #tpu.memory_space<vmem>>, vector<16x150xbf16>
    %c0_1 = arith.constant 0 : index
    %c0_2 = arith.constant 0 : index
    %c0_3 = arith.constant 0 : index
    %c0_4 = arith.constant 0 : index
    %1 = vector.load %arg1[%c0_1, %c0_2, %c0_3, %c0_4] : memref<1x4x150x25xbf16, #tpu.memory_space<vmem>>, vector<1x1x150x25xbf16>
    %2 = vector.shape_cast %1 : vector<1x1x150x25xbf16> to vector<150x25xbf16>
    %cst = arith.constant dense<0.000000e+00> : vector<16x25xf32>
    %3 = tpu.matmul %0, %2, %cst {dimension_numbers = #tpu.dot_dimension_numbers<[1], [0], [0], [1], [0, 0, 1, 1], [], []>} : vector<16x150xbf16>, vector<150x25xbf16>, vector<16x25xf32> -> vector<16x25xf32>
    %c0_5 = arith.constant 0 : index
    %c1 = arith.constant 1 : index
    %c0_6 = arith.constant 0 : index
    %c0_7 = arith.constant 0 : index
    %4 = vector.load %arg1[%c0_5, %c1, %c0_6, %c0_7] : memref<1x4x150x25xbf16, #tpu.memory_space<vmem>>, vector<1x1x150x25xbf16>
    %5 = vector.shape_cast %4 : vector<1x1x150x25xbf16> to vector<150x25xbf16>
    %cst_8 = arith.constant dense<0.000000e+00> : vector<16x25xf32>
    %6 = tpu.matmul %0, %5, %cst_8 {dimension_numbers = #tpu.dot_dimension_numbers<[1], [0], [0], [1], [0, 0, 1, 1], [], []>} : vector<16x150xbf16>, vector<150x25xbf16>, vector<16x25xf32> -> vector<16x25xf32>
    %7 = arith.maximumf %3, %6 : vector<16x25xf32>
    %c0_9 = arith.constant 0 : index
    %c2 = arith.constant 2 : index
    %c0_10 = arith.constant 0 : index
    %c0_11 = arith.constant 0 : index
    %8 = vector.load %arg1[%c0_9, %c2, %c0_10, %c0_11] : memref<1x4x150x25xbf16, #tpu.memory_space<vmem>>, vector<1x1x150x25xbf16>
    %9 = vector.shape_cast %8 : vector<1x1x150x25xbf16> to vector<150x25xbf16>
    %cst_12 = arith.constant dense<0.000000e+00> : vector<16x25xf32>
    %10 = tpu.matmul %0, %9, %cst_12 {dimension_numbers = #tpu.dot_dimension_numbers<[1], [0], [0], [1], [0, 0, 1, 1], [], []>} : vector<16x150xbf16>, vector<150x25xbf16>, vector<16x25xf32> -> vector<16x25xf32>
    %11 = arith.maximumf %7, %10 : vector<16x25xf32>
    %c0_13 = arith.constant 0 : index
    %c3 = arith.constant 3 : index
    %c0_14 = arith.constant 0 : index
    %c0_15 = arith.constant 0 : index
    %12 = vector.load %arg1[%c0_13, %c3, %c0_14, %c0_15] : memref<1x4x150x25xbf16, #tpu.memory_space<vmem>>, vector<1x1x150x25xbf16>
    %13 = vector.shape_cast %12 : vector<1x1x150x25xbf16> to vector<150x25xbf16>
    %cst_16 = arith.constant dense<0.000000e+00> : vector<16x25xf32>
    %14 = tpu.matmul %0, %13, %cst_16 {dimension_numbers = #tpu.dot_dimension_numbers<[1], [0], [0], [1], [0, 0, 1, 1], [], []>} : vector<16x150xbf16>, vector<150x25xbf16>, vector<16x25xf32> -> vector<16x25xf32>
    %15 = arith.maximumf %11, %14 : vector<16x25xf32>
    %c0_17 = arith.constant 0 : index
    %c0_18 = arith.constant 0 : index
    %16 = vector.load %arg3[%c0_17, %c0_18] : memref<16x1xf32, #tpu.memory_space<vmem>>, vector<16x1xf32>
    %17 = vector.broadcast %16 : vector<16x1xf32> to vector<16x25xf32>
    %18 = arith.addf %15, %17 : vector<16x25xf32>
    %cst_19 = arith.constant 0.000000e+00 : f32
    %19 = vector.broadcast %cst_19 : f32 to vector<16x25xf32>
    %20 = arith.maximumf %18, %19 : vector<16x25xf32>
    %21 = vector.extract_strided_slice %20 {offsets = [0, 0], sizes = [16, 1], strides = [1, 1]} : vector<16x25xf32> to vector<16x1xf32>
    %22 = vector.extract_strided_slice %20 {offsets = [0, 1], sizes = [16, 1], strides = [1, 1]} : vector<16x25xf32> to vector<16x1xf32>
    %23 = vector.extract_strided_slice %20 {offsets = [0, 2], sizes = [16, 1], strides = [1, 1]} : vector<16x25xf32> to vector<16x1xf32>
    %24 = vector.extract_strided_slice %20 {offsets = [0, 3], sizes = [16, 1], strides = [1, 1]} : vector<16x25xf32> to vector<16x1xf32>
    %25 = vector.extract_strided_slice %20 {offsets = [0, 4], sizes = [16, 1], strides = [1, 1]} : vector<16x25xf32> to vector<16x1xf32>
    %26 = vector.extract_strided_slice %20 {offsets = [0, 5], sizes = [16, 1], strides = [1, 1]} : vector<16x25xf32> to vector<16x1xf32>
    %27 = vector.extract_strided_slice %20 {offsets = [0, 6], sizes = [16, 1], strides = [1, 1]} : vector<16x25xf32> to vector<16x1xf32>
    %28 = vector.extract_strided_slice %20 {offsets = [0, 7], sizes = [16, 1], strides = [1, 1]} : vector<16x25xf32> to vector<16x1xf32>
    %29 = vector.extract_strided_slice %20 {offsets = [0, 8], sizes = [16, 1], strides = [1, 1]} : vector<16x25xf32> to vector<16x1xf32>
    %30 = vector.extract_strided_slice %20 {offsets = [0, 9], sizes = [16, 1], strides = [1, 1]} : vector<16x25xf32> to vector<16x1xf32>
    %31 = vector.extract_strided_slice %20 {offsets = [0, 10], sizes = [16, 1], strides = [1, 1]} : vector<16x25xf32> to vector<16x1xf32>
    %32 = vector.extract_strided_slice %20 {offsets = [0, 11], sizes = [16, 1], strides = [1, 1]} : vector<16x25xf32> to vector<16x1xf32>
    %33 = vector.extract_strided_slice %20 {offsets = [0, 12], sizes = [16, 1], strides = [1, 1]} : vector<16x25xf32> to vector<16x1xf32>
    %34 = vector.extract_strided_slice %20 {offsets = [0, 13], sizes = [16, 1], strides = [1, 1]} : vector<16x25xf32> to vector<16x1xf32>
    %35 = vector.extract_strided_slice %20 {offsets = [0, 14], sizes = [16, 1], strides = [1, 1]} : vector<16x25xf32> to vector<16x1xf32>
    %36 = vector.extract_strided_slice %20 {offsets = [0, 15], sizes = [16, 1], strides = [1, 1]} : vector<16x25xf32> to vector<16x1xf32>
    %37 = vector.extract_strided_slice %20 {offsets = [0, 16], sizes = [16, 1], strides = [1, 1]} : vector<16x25xf32> to vector<16x1xf32>
    %38 = vector.extract_strided_slice %20 {offsets = [0, 17], sizes = [16, 1], strides = [1, 1]} : vector<16x25xf32> to vector<16x1xf32>
    %39 = vector.extract_strided_slice %20 {offsets = [0, 18], sizes = [16, 1], strides = [1, 1]} : vector<16x25xf32> to vector<16x1xf32>
    %40 = vector.extract_strided_slice %20 {offsets = [0, 19], sizes = [16, 1], strides = [1, 1]} : vector<16x25xf32> to vector<16x1xf32>
    %41 = vector.extract_strided_slice %20 {offsets = [0, 20], sizes = [16, 1], strides = [1, 1]} : vector<16x25xf32> to vector<16x1xf32>
    %42 = vector.extract_strided_slice %20 {offsets = [0, 21], sizes = [16, 1], strides = [1, 1]} : vector<16x25xf32> to vector<16x1xf32>
    %43 = vector.extract_strided_slice %20 {offsets = [0, 22], sizes = [16, 1], strides = [1, 1]} : vector<16x25xf32> to vector<16x1xf32>
    %44 = vector.extract_strided_slice %20 {offsets = [0, 23], sizes = [16, 1], strides = [1, 1]} : vector<16x25xf32> to vector<16x1xf32>
    %45 = vector.extract_strided_slice %20 {offsets = [0, 24], sizes = [16, 1], strides = [1, 1]} : vector<16x25xf32> to vector<16x1xf32>
    %46 = tpu.concatenate %21, %22, %23, %24, %25, %26, %27, %28, %29, %30, %31, %32, %33, %34, %35, %36 in 0 : vector<16x1xf32>, vector<16x1xf32>, vector<16x1xf32>, vector<16x1xf32>, vector<16x1xf32>, vector<16x1xf32>, vector<16x1xf32>, vector<16x1xf32>, vector<16x1xf32>, vector<16x1xf32>, vector<16x1xf32>, vector<16x1xf32>, vector<16x1xf32>, vector<16x1xf32>, vector<16x1xf32>, vector<16x1xf32> -> vector<256x1xf32>
    %47 = tpu.concatenate %37, %38, %39, %40, %41, %42, %43, %44, %45 in 0 : vector<16x1xf32>, vector<16x1xf32>, vector<16x1xf32>, vector<16x1xf32>, vector<16x1xf32>, vector<16x1xf32>, vector<16x1xf32>, vector<16x1xf32>, vector<16x1xf32> -> vector<144x1xf32>
    %48 = tpu.concatenate %46, %47 in 0 : vector<256x1xf32>, vector<144x1xf32> -> vector<400x1xf32>
    %49 = arith.truncf %48 : vector<400x1xf32> to vector<400x1xbf16>
    %c0_20 = arith.constant 0 : index
    %c0_21 = arith.constant 0 : index
    %50 = vector.load %arg4[%c0_20, %c0_21] : memref<128x400xbf16, #tpu.memory_space<vmem>>, vector<128x400xbf16>
    %cst_22 = arith.constant dense<0.000000e+00> : vector<128x1xf32>
    %51 = tpu.matmul %50, %49, %cst_22 {dimension_numbers = #tpu.dot_dimension_numbers<[1], [0], [0], [1], [0, 0, 1, 1], [], []>} : vector<128x400xbf16>, vector<400x1xbf16>, vector<128x1xf32> -> vector<128x1xf32>
    %c0_23 = arith.constant 0 : index
    %c0_24 = arith.constant 0 : index
    %52 = vector.load %arg5[%c0_23, %c0_24] : memref<128x1xf32, #tpu.memory_space<vmem>>, vector<128x1xf32>
    %53 = arith.addf %51, %52 : vector<128x1xf32>
    %cst_25 = arith.constant 0.000000e+00 : f32
    %54 = vector.broadcast %cst_25 : f32 to vector<128x1xf32>
    %55 = arith.maximumf %53, %54 : vector<128x1xf32>
    %56 = arith.truncf %55 : vector<128x1xf32> to vector<128x1xbf16>
    %c0_26 = arith.constant 0 : index
    %c0_27 = arith.constant 0 : index
    %57 = vector.load %arg6[%c0_26, %c0_27] : memref<128x128xbf16, #tpu.memory_space<vmem>>, vector<128x128xbf16>
    %cst_28 = arith.constant dense<0.000000e+00> : vector<128x1xf32>
    %58 = tpu.matmul %57, %56, %cst_28 {dimension_numbers = #tpu.dot_dimension_numbers<[1], [0], [0], [1], [0, 0, 1, 1], [], []>} : vector<128x128xbf16>, vector<128x1xbf16>, vector<128x1xf32> -> vector<128x1xf32>
    %c0_29 = arith.constant 0 : index
    %c0_30 = arith.constant 0 : index
    %59 = vector.load %arg7[%c0_29, %c0_30] : memref<128x1xf32, #tpu.memory_space<vmem>>, vector<128x1xf32>
    %60 = arith.addf %58, %59 : vector<128x1xf32>
    %cst_31 = arith.constant 0.000000e+00 : f32
    %61 = vector.broadcast %cst_31 : f32 to vector<128x1xf32>
    %62 = arith.maximumf %60, %61 : vector<128x1xf32>
    %63 = arith.truncf %62 : vector<128x1xf32> to vector<128x1xbf16>
    %c0_32 = arith.constant 0 : index
    %c0_33 = arith.constant 0 : index
    %64 = vector.load %arg8[%c0_32, %c0_33] : memref<10x128xbf16, #tpu.memory_space<vmem>>, vector<10x128xbf16>
    %cst_34 = arith.constant dense<0.000000e+00> : vector<10x1xf32>
    %65 = tpu.matmul %64, %63, %cst_34 {dimension_numbers = #tpu.dot_dimension_numbers<[1], [0], [0], [1], [0, 0, 1, 1], [], []>} : vector<10x128xbf16>, vector<128x1xbf16>, vector<10x1xf32> -> vector<10x1xf32>
    %c0_35 = arith.constant 0 : index
    %c0_36 = arith.constant 0 : index
    %66 = vector.load %arg9[%c0_35, %c0_36] : memref<10x1xf32, #tpu.memory_space<vmem>>, vector<10x1xf32>
    %67 = arith.addf %65, %66 : vector<10x1xf32>
    %c0_37 = arith.constant 0 : index
    %c0_38 = arith.constant 0 : index
    %c0_39 = arith.constant 0 : index
    %68 = vector.load %arg10[%c0_37, %c0_38, %c0_39] : memref<1x10x1xf32, #tpu.memory_space<vmem>>, vector<1x10x1xf32>
    %69 = vector.shape_cast %68 : vector<1x10x1xf32> to vector<10x1xf32>
    %70 = vector.shape_cast %67 : vector<10x1xf32> to vector<1x10x1xf32>
    tpu.vector_store %arg10[%c0_37, %c0_38, %c0_39], %70 {strides = array<i32>} : memref<1x10x1xf32, #tpu.memory_space<vmem>>, vector<1x10x1xf32>,
    return
  }
  func.func @transform_0(%arg0: i32) -> (i32, i32, i32, i32) {
    %c0_i32 = arith.constant 0 : i32
    %c0_i32_0 = arith.constant 0 : i32
    %c0_i32_1 = arith.constant 0 : i32
    %c0_i32_2 = arith.constant 0 : i32
    return %arg0, %c0_i32, %c0_i32_0, %c0_i32_1 : i32, i32, i32, i32
  }
  func.func @transform_1(%arg0: i32) -> (i32, i32) {
    %c0_i32 = arith.constant 0 : i32
    %c0_i32_0 = arith.constant 0 : i32
    %c0_i32_1 = arith.constant 0 : i32
    return %c0_i32, %c0_i32_0 : i32, i32
  }
  func.func @transform_2(%arg0: i32) -> (i32, i32) {
    %c0_i32 = arith.constant 0 : i32
    %c0_i32_0 = arith.constant 0 : i32
    %c0_i32_1 = arith.constant 0 : i32
    return %c0_i32, %c0_i32_0 : i32, i32
  }
  func.func @transform_3(%arg0: i32) -> (i32, i32) {
    %c0_i32 = arith.constant 0 : i32
    %c0_i32_0 = arith.constant 0 : i32
    %c0_i32_1 = arith.constant 0 : i32
    return %c0_i32, %c0_i32_0 : i32, i32
  }
  func.func @transform_4(%arg0: i32) -> (i32, i32) {
    %c0_i32 = arith.constant 0 : i32
    %c0_i32_0 = arith.constant 0 : i32
    %c0_i32_1 = arith.constant 0 : i32
    return %c0_i32, %c0_i32_0 : i32, i32
  }
  func.func @transform_5(%arg0: i32) -> (i32, i32) {
    %c0_i32 = arith.constant 0 : i32
    %c0_i32_0 = arith.constant 0 : i32
    %c0_i32_1 = arith.constant 0 : i32
    return %c0_i32, %c0_i32_0 : i32, i32
  }
  func.func @transform_6(%arg0: i32) -> (i32, i32) {
    %c0_i32 = arith.constant 0 : i32
    %c0_i32_0 = arith.constant 0 : i32
    %c0_i32_1 = arith.constant 0 : i32
    return %c0_i32, %c0_i32_0 : i32, i32
  }
  func.func @transform_7(%arg0: i32) -> (i32, i32) {
    %c0_i32 = arith.constant 0 : i32
    %c0_i32_0 = arith.constant 0 : i32
    %c0_i32_1 = arith.constant 0 : i32
    return %c0_i32, %c0_i32_0 : i32, i32
  }
  func.func @transform_8(%arg0: i32) -> (i32, i32) {
    %c0_i32 = arith.constant 0 : i32
    %c0_i32_0 = arith.constant 0 : i32
    %c0_i32_1 = arith.constant 0 : i32
    return %c0_i32, %c0_i32_0 : i32, i32
  }
  func.func @transform_9(%arg0: i32) -> (i32, i32, i32) {
    %c0_i32 = arith.constant 0 : i32
    %c0_i32_0 = arith.constant 0 : i32
    %c0_i32_1 = arith.constant 0 : i32
    return %arg0, %c0_i32, %c0_i32_0 : i32, i32, i32
  }
}

</mosaic_0001>

<bundles_post_ra>
// kernel: lenet_forward.2
= control target key start
LH: loop header
LB: loop body
LE: loop exit
PB: predicated region body
PF: predicated region fallthrough
CT: control target
= control target key end

     0   :  { %s614_s12 = smov 0   ;;  %s669_s0 = inlined_call_operand.vmem [shape: bf16[2,25,1024], index: 0, kind: input, shape index: {}]   ;;  %s670_s1 = inlined_call_operand.vmem [shape: bf16[6,25], index: 1, kind: input, shape index: {}]   ;;  %s671_s2 = inlined_call_operand.vmem [shape: f32[6,1], index: 2, kind: input, shape index: {}]   ;;  %s672_s3 = inlined_call_operand.vmem [shape: bf16[6,512], index: 3, kind: output, shape index: {}]  }
   0x1 LB: > { %s620_s13 = sadd.s32 4294967295, %s590_s12   ;;  %p543_p0 = scmp.ge.s32.totalorder %s590_s12, 1  ;;  %s590_s12 = sphi %s614_s12, %s13_s12  }
   0x2   : > { %p137_p1 = scmp.lt.s32.totalorder %s590_s12, 3 }
   0x4   : > { %p138_p2 = pnand %p543_p0, %p137_p1 }
   0x5   : > { %p161_p3 = scmp.lt.s32.totalorder (!%p138_p2), %s620_s13, 1  ;;  %s546_s23 = sshll.u32 (!%p138_p2), %s620_s13, 1 }
   0x6   : > { %141 = sbr.rel (%p138_p2) target bundleno = 243 (0xf3), region = 32  ;;  %p167_p4 = scmp.lt.s32.totalorder (!%p138_p2), %s546_s23, 3 }
   0xb   : > { %vm266_vm0 = vcmask 1043456   ;;  %v592_v0 = vmov 0   ;;  %v464_v1 = vld [vmem:[%s671_s2] sm:$0x3f]  ;;  %s162_s16 = scalar_select %p161_p3, %s620_s13, 1  ;;  %vm267_vm1 = vcmask 1044480  }
   0xc   : > { %326 = vmatprep.mubr.bf16.mxu0 %v592_v0  ;;  %367 = vmatprep.mubr.bf16.mxu1 %v592_v0  ;;  %v593_v2 = vmov 65535   ;;  %v173_v39 = vld [vmem:[%s670_s1] sm:$0x7]  ;;  %vm262_vm2 = vcmask 203776   ;;  %s674_s23 = smov (!%p167_p4, %s546_s23), 3 }
   0xd   : > { %583 = vset.pattern.permute.xlu0 %v592_v0  ;;  %v268_v3 = vsel %vm266_vm0, 4294967295, %v593_v2  ;;  %s571_s17 = sshll.u32 %s162_s16, 7  ;;  %s547_s24 = sshll.u32 %s674_s23, 2 }
   0xe   : > { %467 = vperm.xlu0 %583, %v464_v1   ;;  %s635_s20 = scalar_lea.vmem %s669_s0, %s571_s17  ;;  %v269_v6 = vsel %vm267_vm1, %v268_v3, 0  ;;  %s170_s27 = scalar_lea.vmem %s672_s3, %s547_s24 }
   0xf   : > { %v182_v4 = vld [vmem:[%s635_s20 + $0x40] sm:$0xff]  ;;  %v183_v7 = vld [vmem:[%s635_s20 + $0x48] sm:$0xff]  ;;  %v184_v17 = vld [vmem:[%s635_s20 + $0x50] sm:$0xff] }
  0x10   : > { %v186_v5 = vld [vmem:[%s635_s20 + $0x60] sm:$0x11]  ;;  %v187_v9 = vld [vmem:[%s635_s20 + $0x68] sm:$0x11]  ;;  %v188_v21 = vld [vmem:[%s635_s20 + $0x70] sm:$0x11] }
  0x11   : > { %v557_v8 = vcombine.high %v182_v4, %v186_v5  ;;  %v556_v10 = vcombine.low %v182_v4, %v186_v5  ;;  %v174_v11 = vld [vmem:[%s635_s20] sm:$0xff]  ;;  %v559_v13 = vcombine.high %v183_v7, %v187_v9  ;;  %v558_v14 = vcombine.low %v183_v7, %v187_v9  ;;  %v175_v15 = vld [vmem:[%s635_s20 + $0x8] sm:$0xff]  ;;  %v185_v22 = vld [vmem:[%s635_s20 + $0x58] sm:$0xff] }
  0x12   : > { %v178_v12 = vld [vmem:[%s635_s20 + $0x20] sm:$0xff]  ;;  %v179_v16 = vld [vmem:[%s635_s20 + $0x28] sm:$0xff]  ;;  %v189_v23 = vld [vmem:[%s635_s20 + $0x78] sm:$0x11]  ;;  %v561_v27 = vcombine.high %v184_v17, %v188_v21  ;;  %v560_v30 = vcombine.low %v184_v17, %v188_v21 }
  0x13   : > { %v274_v18 = vand.u32 %v557_v8, %v269_v6  ;;  %v271_v19 = vand.u32 %v556_v10, %v269_v6  ;;  %v549_v20 = vcombine.high %v174_v11, %v178_v12  ;;  %v280_v24 = vand.u32 %v559_v13, %v269_v6  ;;  %v176_v35 = vld [vmem:[%s635_s20 + $0x10] sm:$0xff]  ;;  %v177_v37 = vld [vmem:[%s635_s20 + $0x18] sm:$0xff] }
  0x14   : > { %v277_v25 = vand.u32 %v558_v14, %v269_v6  ;;  %v551_v26 = vcombine.high %v175_v15, %v179_v16  ;;  %v563_v28 = vcombine.high %v185_v22, %v189_v23  ;;  %v548_v29 = vcombine.low %v174_v11, %v178_v12  ;;  %v180_v36 = vld [vmem:[%s635_s20 + $0x30] sm:$0xff]  ;;  %v181_v38 = vld [vmem:[%s635_s20 + $0x38] sm:$0xff] }
  0x15   : > { %306 = vmatprep.subr.bf16.mxu0 %v274_v18  ;;  %347 = vmatprep.subr.bf16.mxu1 %v280_v24  ;;  %v550_v31 = vcombine.low %v175_v15, %v179_v16  ;;  %v286_v32 = vand.u32 %v561_v27, %v269_v6  ;;  %v562_v33 = vcombine.low %v185_v22, %v189_v23 }
  0x16   : > { %307 = vmatpush1.bf16.msra.mxu0 %v271_v19  ;;  %348 = vmatpush1.bf16.msra.mxu1 %v277_v25  ;;  %v292_v34 = vand.u32 %v563_v28, %v269_v6  ;;  %v283_v40 = vand.u32 %v560_v30, %v269_v6  ;;  %v553_v42 = vcombine.high %v176_v35, %v180_v36 }
  0x17   : > { %308 = vmatprep.subr.bf16.mxu0 %v549_v20  ;;  %349 = vmatprep.subr.bf16.mxu1 %v551_v26  ;;  %v289_v41 = vand.u32 %v562_v33, %v269_v6  ;;  %v555_v43 = vcombine.high %v177_v37, %v181_v38  ;;  %v552_v44 = vcombine.low %v176_v35, %v180_v36 }
  0x18   : > { %v554_v45 = vcombine.low %v177_v37, %v181_v38 }
  0x1a   : > { %309 = vmatpush1.bf16.msra.mxu0 %v548_v29  ;;  %350 = vmatpush1.bf16.msra.mxu1 %v550_v31 }
  0x1b   : > { %388 = vmatprep.subr.bf16.mxu0 %v286_v32  ;;  %429 = vmatprep.subr.bf16.mxu1 %v292_v34 }
  0x1d   : > { %564 = vmatmul.mubr.msk.bf16.vlgmr.msra.gmra.mxu0 %vm262_vm2, %v173_v39  ;;  %565 = vmatmul.mubr.msk.bf16.vlgmr.msra.gmra.mxu1 %vm262_vm2, %v173_v39 }
  0x1e   : > { %389 = vmatpush1.bf16.msra.mxu0 %v283_v40  ;;  %430 = vmatpush1.bf16.msra.mxu1 %v289_v41 }
  0x1f   : > { %390 = vmatprep.subr.bf16.mxu0 %v553_v42  ;;  %431 = vmatprep.subr.bf16.mxu1 %v555_v43 }
  0x20   : > { %408 = vmatprep.mubr.bf16.mxu0 %v592_v0  ;;  %449 = vmatprep.mubr.bf16.mxu1 %v592_v0 }
  0x22   : > { %391 = vmatpush1.bf16.msra.mxu0 %v552_v44  ;;  %432 = vmatpush1.bf16.msra.mxu1 %v554_v45 }
  0x25   : > { %566 = vmatmul.mubr.msk.bf16.vlgmr.msra.gmra.mxu0 %vm262_vm2, %v173_v39  ;;  %567 = vmatmul.mubr.msk.bf16.vlgmr.msra.gmra.mxu1 %vm262_vm2, %v173_v39 }
  0x89   : > { %v468_v60 = vpop.permute.xlu0 %467 }
  0xdd   : > { %v328_v46 = vpop.f32.mrf.mxu0  ;;  %v369_v47 = vpop.f32.mrf.mxu1 }
  0xde   : > { %v458_v56 = vmax.f32 %v328_v46, %v369_v47 }
  0xdf   : > { %v330_v48 = vpop.f32.mrf.mxu0  ;;  %v371_v49 = vpop.f32.mrf.mxu1 }
  0xe0   : > { %v459_v61 = vmax.f32 %v330_v48, %v371_v49 }
  0xe1   : > { %v332_v50 = vpop.f32.mrf.mxu0  ;;  %v373_v51 = vpop.f32.mrf.mxu1 }
  0xe3   : > { %v333_v52 = vpop.f32.mrf.mxu0  ;;  %v374_v53 = vpop.f32.mrf.mxu1 }
  0xe5   : > { %v410_v54 = vpop.f32.mrf.mxu0  ;;  %v451_v55 = vpop.f32.mrf.mxu1 }
  0xe6   : > { %v460_v57 = vmax.f32 %v410_v54, %v451_v55 }
  0xe7   : > { %v412_v58 = vpop.f32.mrf.mxu0  ;;  %v453_v59 = vpop.f32.mrf.mxu1 }
  0xe8   : > { %v461_v62 = vmax.f32 %v412_v58, %v453_v59  ;;  %v462_v63 = vmax.f32 %v458_v56, %v460_v57 }
  0xe9   : > { %v414_v0 = vpop.f32.mrf.mxu0  ;;  %v455_v1 = vpop.f32.mrf.mxu1 }
  0xea   : > { %v463_v2 = vmax.f32 %v459_v61, %v461_v62  ;;  %v470_v3 = vadd.f32 %v468_v60, %v462_v63 }
  0xeb   : > { %v415_v4 = vpop.f32.mrf.mxu0  ;;  %v456_v5 = vpop.f32.mrf.mxu1 }
  0xec   : > { %v471_v6 = vadd.f32 %v468_v60, %v463_v2  ;;  %v472_v7 = vmax.f32 %v470_v3, 0.0 }
  0xee   : > { %v473_v8 = vmax.f32 %v471_v6, 0.0 }
  0xf0   : > { %v572_v9 = vpack.c.bf16 %v473_v8, %v472_v7 }
  0xf2   : > { %482 = vst [vmem:[%s170_s27] sm:$0x77] %v572_v9 }
  0xf3 PF: > { %s13_s12 = sadd.s32 1, %s590_s12  }
  0xf4   : > { %p10_p5 = scmp.ge.s32.totalorder %s13_s12, 4  }
  0xf6   :  { %12 = sbr.rel (!%p10_p5) target bundleno = 1 (0x1), region = 62 }

// kernel: lenet_forward.3
= control target key start
LH: loop header
LB: loop body
LE: loop exit
PB: predicated region body
PF: predicated region fallthrough
CT: control target
= control target key end

     0   :  { %s2410_s30 = smov 0   ;;  %s2887_s0 = inlined_call_operand.vmem [shape: bf16[2,4,150,25], index: 0, kind: input, shape index: {}]   ;;  %s2888_s1 = inlined_call_operand.vmem [shape: bf16[16,150], index: 1, kind: input, shape index: {}]   ;;  %s2889_s2 = inlined_call_operand.vmem [shape: f32[16,1], index: 2, kind: input, shape index: {}]   ;;  %s2890_s3 = inlined_call_operand.vmem [shape: bf16[128,400], index: 3, kind: input, shape index: {}]   ;;  %s2891_s4 = inlined_call_operand.vmem [shape: f32[128,1], index: 4, kind: input, shape index: {}]   ;;  %s2892_s5 = inlined_call_operand.vmem [shape: bf16[128,128], index: 5, kind: input, shape index: {}]   ;;  %s2893_s6 = inlined_call_operand.vmem [shape: f32[128,1], index: 6, kind: input, shape index: {}]   ;;  %s2894_s7 = inlined_call_operand.vmem [shape: bf16[10,128], index: 7, kind: input, shape index: {}]   ;;  %s2895_s8 = inlined_call_operand.vmem [shape: f32[10,1], index: 8, kind: input, shape index: {}]   ;;  %s2896_s9 = inlined_call_operand.vmem [shape: f32[2,10,1], index: 9, kind: output, shape index: {}]  }
   0x1 LB: > { %s1780_s10 = sadd.s32 4294967295, %s2339_s30   ;;  %p1784_p0 = scmp.ge.s32.totalorder %s2339_s30, 1  ;;  %s2339_s30 = sphi %s2410_s30, %s19_s30  }
   0x2   : > { %p287_p1 = scmp.lt.s32.totalorder %s2339_s30, 3 }
   0x4   : > { %p288_p2 = pnand %p1784_p0, %p287_p1 }
   0x5   : > { %p323_p3 = scmp.lt.s32.totalorder (!%p288_p2), %s1780_s10, 1  ;;  %s2342_s23 = smov (!%p288_p2), 123  }
   0x6   : > { %291 = sbr.rel (%p288_p2) target bundleno = 1320 (0x528), region = 56  ;;  %s2343_s24 = smov (!%p288_p2), 121  }
   0x7   : > { %s2344_s25 = smov (!%p288_p2), 125   ;;  %s2345_s26 = smov (!%p288_p2), 122  }
   0x8   : > { %s2346_s27 = smov (!%p288_p2), 127   ;;  %s2347_s28 = smov (!%p288_p2), 124  }
   0x9   : > { %s2348_s29 = smov (!%p288_p2), 113   ;;  %s2349_s11 = smov (!%p288_p2), 126  }
   0xa   : > { %s2350_s12 = smov (!%p288_p2), 114   ;;  %s2351_s13 = smov (!%p288_p2), 120  }
   0xb   : > { %vm421_vm0 = vcmask 179200   ;;  %v2341_v0 = vmov 0   ;;  %v2423_v1 = vld [vmem:[%s2888_s1 + $0x4] ss:$8 sps:$4 sm:$0xff]   ;;  %s2898_s10 = smov (!%p323_p3, %s1780_s10), 1  ;;  %vm425_vm1 = vcmask 1042432  }
   0xc   : > { %429 = vmatprep.subr.bf16.mxu0 %v2341_v0  ;;  %550 = vmatprep.subr.bf16.mxu1 %v2341_v0  ;;  %v839_v2 = vld [vmem:[%s2889_s2] sm:$0xff]  ;;  %v840_v3 = vld [vmem:[%s2889_s2 + $0x8] sm:$0xff]  ;;  %s2084_s17 = smul.u32 304, %s2898_s10  ;;  %s2352_s14 = smov 115   ;;  %vm1226_vm2 = vcmask 130048   ;;  %vm2359_vm3 = vmmov 0  }
   0xd   : > { %2112 = vset.pattern.permute.xlu0 %v2341_v0  ;;  %1800 = vmatprep.mubr.msk.bf16.mxu0 %vm421_vm0, %v2423_v1  ;;  %v2487_v26 = vld [vmem:[%s2888_s1] ss:$8 sps:$4 sm:$0xff]   ;;  %s2353_s15 = smov 116   ;;  %s2354_s16 = smov 117   ;;  %vm1721_vm4 = vcmask 7168   ;;  %vm1723_vm5 = vcmask 1024  }
   0xe   : > { %1830 = vmatprep.mubr.msk.bf16.mxu1 %vm421_vm0, %v2423_v1  ;;  %843 = vperm.xlu0 %2112, %v839_v2   ;;  %s2442_s20 = scalar_lea.vmem %s2887_s0, %s2084_s17  ;;  %s2355_s17 = smov 118  }
   0xf   : > { %v2233_v4 = vld [vmem:[%s2442_s20 + $0x38] sm:$0xff]   ;;  %v2234_v5 = vld [vmem:[%s2442_s20 + $0x84] sm:$0xff]   ;;  %v2235_v6 = vld [vmem:[%s2442_s20 + $0x30] sm:$0xff]   ;;  %s2356_s18 = smov 119   ;;  %s2357_s19 = smov 112  }
  0x10   : > { %430 = vmatpush1.bf16.msra.mxu0 %v2233_v4  ;;  %551 = vmatpush1.bf16.msra.mxu1 %v2234_v5  ;;  %v2236_v7 = vld [vmem:[%s2442_s20 + $0x7c] sm:$0xff]   ;;  %v2237_v8 = vld [vmem:[%s2442_s20 + $0x28] sm:$0xff]   ;;  %v2238_v9 = vld [vmem:[%s2442_s20 + $0x74] sm:$0xff]  }
  0x11   : > { %431 = vmatprep.subr.bf16.mxu0 %v2341_v0  ;;  %552 = vmatprep.subr.bf16.mxu1 %v2341_v0  ;;  %v2239_v10 = vld [vmem:[%s2442_s20 + $0x20] sm:$0xff]   ;;  %v2240_v11 = vld [vmem:[%s2442_s20 + $0x6c] sm:$0xff]   ;;  %v2241_v12 = vld [vmem:[%s2442_s20 + $0x18] sm:$0xff]  }
  0x12   : > { %848 = vperm.xlu0 %2112, %v840_v3   ;;  %v2242_v13 = vld [vmem:[%s2442_s20 + $0x64] sm:$0xff]   ;;  %v2243_v14 = vld [vmem:[%s2442_s20 + $0x10] sm:$0xff]   ;;  %v2244_v15 = vld [vmem:[%s2442_s20 + $0x5c] sm:$0xff]  }
  0x13   : > { %v2245_v16 = vld [vmem:[%s2442_s20 + $0x8] sm:$0xff]   ;;  %v2246_v17 = vld [vmem:[%s2442_s20 + $0x54] sm:$0xff]   ;;  %v2247_v19 = vld [vmem:[%s2442_s20] sm:$0xff]  }
  0x14   : > { %432 = vmatpush1.bf16.msra.mxu0 %v2235_v6  ;;  %553 = vmatpush1.bf16.msra.mxu1 %v2236_v7  ;;  %v2249_v18 = vld [vmem:[%s2442_s20 + $0x48] ss:$0 sps:$4 sm:$0x77]   ;;  %v2250_v20 = vld [vmem:[%s2442_s20 + $0x94] ss:$0 sps:$4 sm:$0x77]  }
  0x15   : > { %433 = vmatprep.subr.bf16.mxu0 %v2341_v0  ;;  %554 = vmatprep.subr.bf16.mxu1 %v2341_v0  ;;  %v2248_v21 = vld [vmem:[%s2442_s20 + $0x4c] sm:$0xff]   ;;  %v427_v22 = vsel %vm425_vm1, %v2249_v18, 0  ;;  %v548_v23 = vsel %vm425_vm1, %v2250_v20, 0  ;;  %v2251_v24 = vld [vmem:[%s2442_s20 + $0x40] sm:$0xff]   ;;  %v2259_v30 = vld [vmem:[%s2442_s20 + $0x114] sm:$0xff]  }
  0x16   : > { %v2252_v25 = vld [vmem:[%s2442_s20 + $0x8c] sm:$0xff]   ;;  %v2257_v28 = vld [vmem:[%s2442_s20 + $0x11c] sm:$0xff]   ;;  %v2263_v34 = vld [vmem:[%s2442_s20 + $0x104] sm:$0xff]  }
  0x17   : > { %v2256_v27 = vld [vmem:[%s2442_s20 + $0xd0] sm:$0xff]   ;;  %v2258_v29 = vld [vmem:[%s2442_s20 + $0xc8] sm:$0xff]   ;;  %v2260_v31 = vld [vmem:[%s2442_s20 + $0xc0] sm:$0xff]  }
  0x18   : > { %434 = vmatpush1.bf16.msra.mxu0 %v2237_v8  ;;  %555 = vmatpush1.bf16.msra.mxu1 %v2238_v9  ;;  %v2261_v32 = vld [vmem:[%s2442_s20 + $0x10c] sm:$0xff]   ;;  %v2262_v33 = vld [vmem:[%s2442_s20 + $0xb8] sm:$0xff]   ;;  %v2268_v39 = vld [vmem:[%s2442_s20 + $0xa0] sm:$0xff]  }
  0x19   : > { %435 = vmatprep.subr.bf16.mxu0 %v2341_v0  ;;  %556 = vmatprep.subr.bf16.mxu1 %v2341_v0  ;;  %v2264_v35 = vld [vmem:[%s2442_s20 + $0xb0] sm:$0xff]   ;;  %v2265_v36 = vld [vmem:[%s2442_s20 + $0xfc] sm:$0xff]   ;;  %v2266_v37 = vld [vmem:[%s2442_s20 + $0xa8] sm:$0xff]  }
  0x1a   : > { %v2267_v38 = vld [vmem:[%s2442_s20 + $0xf4] sm:$0xff]   ;;  %v2269_v40 = vld [vmem:[%s2442_s20 + $0xec] sm:$0xff]   ;;  %v2271_v42 = vld [vmem:[%s2442_s20 + $0xe4] sm:$0xff]  }
  0x1b   : > { %v2270_v41 = vld [vmem:[%s2442_s20 + $0x98] sm:$0xff]   ;;  %v2272_v43 = vld [vmem:[%s2442_s20 + $0xe0] ss:$0 sps:$4 sm:$0x77]   ;;  %v2275_v48 = vld [vmem:[%s2442_s20 + $0x124] sm:$0xff]  }
  0x1c   : > { %436 = vmatpush1.bf16.msra.mxu0 %v2239_v10  ;;  %557 = vmatpush1.bf16.msra.mxu1 %v2240_v11  ;;  %v2273_v44 = vld [vmem:[%s2442_s20 + $0x12c] ss:$0 sps:$4 sm:$0x77]   ;;  %v671_v45 = vsel %vm425_vm1, %v2272_v43, 0  ;;  %v2274_v47 = vld [vmem:[%s2442_s20 + $0xd8] sm:$0xff]  }
  0x1d   : > { %437 = vmatprep.subr.bf16.mxu0 %v2341_v0  ;;  %558 = vmatprep.subr.bf16.mxu1 %v2341_v0  ;;  %v794_v46 = vsel %vm425_vm1, %v2273_v44, 0 }
  0x20   : > { %438 = vmatpush1.bf16.msra.mxu0 %v2241_v12  ;;  %559 = vmatpush1.bf16.msra.mxu1 %v2242_v13 }
  0x21   : > { %439 = vmatprep.subr.bf16.mxu0 %v2341_v0  ;;  %560 = vmatprep.subr.bf16.mxu1 %v2341_v0 }
  0x24   : > { %440 = vmatpush1.bf16.msra.mxu0 %v2243_v14  ;;  %561 = vmatpush1.bf16.msra.mxu1 %v2244_v15 }
  0x25   : > { %441 = vmatprep.subr.bf16.mxu0 %v2341_v0  ;;  %562 = vmatprep.subr.bf16.mxu1 %v2341_v0 }
  0x28   : > { %442 = vmatpush1.bf16.msra.mxu0 %v2245_v16  ;;  %563 = vmatpush1.bf16.msra.mxu1 %v2246_v17 }
  0x29   : > { %443 = vmatprep.subr.bf16.mxu0 %v2341_v0  ;;  %564 = vmatprep.subr.bf16.mxu1 %v2341_v0 }
  0x2c   : > { %444 = vmatpush1.bf16.msra.mxu0 %v2247_v19  ;;  %565 = vmatpush1.bf16.msra.mxu1 %v2248_v21 }
  0x2d   : > { %457 = vmatprep.subr.bf16.mxu0 %v2341_v0  ;;  %578 = vmatprep.subr.bf16.mxu1 %v2341_v0 }
  0x30   : > { %458 = vmatpush2.bf16.msra.mxu0 %v427_v22  ;;  %579 = vmatpush2.bf16.msra.mxu1 %v548_v23 }
  0x31   : > { %459 = vmatprep.subr.bf16.mxu0 %v2341_v0  ;;  %580 = vmatprep.subr.bf16.mxu1 %v2341_v0 }
  0x34   : > { %460 = vmatpush2.bf16.msra.mxu0 %v2251_v24  ;;  %581 = vmatpush2.bf16.msra.mxu1 %v2252_v25 }
  0x35   : > { %673 = vmatprep.subr.bf16.mxu0 %v2341_v0  ;;  %796 = vmatprep.subr.bf16.mxu1 %v2341_v0 }
  0x37   : > { %462 = vmatmul.mubr.bf16.vlgmr.msra.gmra.mxu0 %v2487_v26  ;;  %583 = vmatmul.mubr.bf16.vlgmr.msra.gmra.mxu1 %v2487_v26 }
  0x38   : > { %674 = vmatpush1.bf16.msra.mxu0 %v2256_v27  ;;  %797 = vmatpush1.bf16.msra.mxu1 %v2257_v28 }
  0x39   : > { %675 = vmatprep.subr.bf16.mxu0 %v2341_v0  ;;  %798 = vmatprep.subr.bf16.mxu1 %v2341_v0 }
  0x3a   : > { %1860 = vmatprep.mubr.msk.bf16.mxu0 %vm421_vm0, %v2423_v1  ;;  %1890 = vmatprep.mubr.msk.bf16.mxu1 %vm421_vm0, %v2423_v1 }
  0x3c   : > { %676 = vmatpush1.bf16.msra.mxu0 %v2258_v29  ;;  %799 = vmatpush1.bf16.msra.mxu1 %v2259_v30 }
  0x3d   : > { %677 = vmatprep.subr.bf16.mxu0 %v2341_v0  ;;  %800 = vmatprep.subr.bf16.mxu1 %v2341_v0 }
  0x40   : > { %678 = vmatpush1.bf16.msra.mxu0 %v2260_v31  ;;  %801 = vmatpush1.bf16.msra.mxu1 %v2261_v32 }
  0x41   : > { %679 = vmatprep.subr.bf16.mxu0 %v2341_v0  ;;  %802 = vmatprep.subr.bf16.mxu1 %v2341_v0 }
  0x44   : > { %680 = vmatpush1.bf16.msra.mxu0 %v2262_v33  ;;  %803 = vmatpush1.bf16.msra.mxu1 %v2263_v34 }
  0x45   : > { %681 = vmatprep.subr.bf16.mxu0 %v2341_v0  ;;  %804 = vmatprep.subr.bf16.mxu1 %v2341_v0 }
  0x48   : > { %682 = vmatpush1.bf16.msra.mxu0 %v2264_v35  ;;  %805 = vmatpush1.bf16.msra.mxu1 %v2265_v36 }
  0x49   : > { %683 = vmatprep.subr.bf16.mxu0 %v2341_v0  ;;  %806 = vmatprep.subr.bf16.mxu1 %v2341_v0 }
  0x4c   : > { %684 = vmatpush1.bf16.msra.mxu0 %v2266_v37  ;;  %807 = vmatpush1.bf16.msra.mxu1 %v2267_v38 }
  0x4d   : > { %685 = vmatprep.subr.bf16.mxu0 %v2341_v0  ;;  %808 = vmatprep.subr.bf16.mxu1 %v2341_v0 }
  0x50   : > { %686 = vmatpush1.bf16.msra.mxu0 %v2268_v39  ;;  %809 = vmatpush1.bf16.msra.mxu1 %v2269_v40 }
  0x51   : > { %687 = vmatprep.subr.bf16.mxu0 %v2341_v0  ;;  %810 = vmatprep.subr.bf16.mxu1 %v2341_v0 }
  0x54   : > { %688 = vmatpush1.bf16.msra.mxu0 %v2270_v41  ;;  %811 = vmatpush1.bf16.msra.mxu1 %v2271_v42  ;;  %v2278_v41 = vld [vmem:[%s2890_s3 + $0x4] ss:$16 sps:$4 sm:$0xff]  }
  0x55   : > { %701 = vmatprep.subr.bf16.mxu0 %v2341_v0  ;;  %824 = vmatprep.subr.bf16.mxu1 %v2341_v0 }
  0x58   : > { %702 = vmatpush2.bf16.msra.mxu0 %v671_v45  ;;  %825 = vmatpush2.bf16.msra.mxu1 %v794_v46 }
  0x59   : > { %703 = vmatprep.subr.bf16.mxu0 %v2341_v0  ;;  %826 = vmatprep.subr.bf16.mxu1 %v2341_v0 }
  0x5c   : > { %704 = vmatpush2.bf16.msra.mxu0 %v2274_v47  ;;  %827 = vmatpush2.bf16.msra.mxu1 %v2275_v48 }
  0x5d   : > { %1348 = vmatprep.subr.bf16.mxu1 %v2341_v0 }
  0x5f   : > { %706 = vmatmul.mubr.bf16.vlgmr.msra.gmra.mxu0 %v2487_v26  ;;  %829 = vmatmul.mubr.bf16.vlgmr.msra.gmra.mxu1 %v2487_v26 }
  0x60   : > { %1283 = vmatprep.mubr.bf16.mxu0 %v2278_v41 }
  0x89   : > { %v844_v61 = vpop.permute.xlu0 %843 }
  0x8d   : > { %v849_v10 = vpop.permute.xlu0 %848 }
  0xf7   : > { %v463_v49 = vpop.f32.mrf.mxu0  ;;  %v584_v50 = vpop.f32.mrf.mxu1 }
  0xf8   : > { %v591_v57 = vmax.f32 %v463_v49, %v584_v50 }
  0xf9   : > { %v465_v51 = vpop.f32.mrf.mxu0  ;;  %v586_v52 = vpop.f32.mrf.mxu1 }
  0xfb   : > { %v466_v53 = vpop.f32.mrf.mxu0  ;;  %v587_v54 = vpop.f32.mrf.mxu1 }
  0xfc   : > { %v592_v63 = vmax.f32 %v466_v53, %v587_v54 }
  0xfd   : > { %v468_v55 = vpop.f32.mrf.mxu0  ;;  %v589_v56 = vpop.f32.mrf.mxu1 }
 0x11f   : > { %v707_v58 = vpop.f32.mrf.mxu0  ;;  %v830_v60 = vpop.f32.mrf.mxu1 }
 0x120   : > { %v714_v59 = vmax.f32 %v591_v57, %v707_v58 }
 0x121   : > { %v709_v62 = vpop.f32.mrf.mxu0  ;;  %v832_v2 = vpop.f32.mrf.mxu1 }
 0x122   : > { %v837_v1 = vmax.f32 %v714_v59, %v830_v60  ;;  %v2282_v62 = vld [vmem:[%s2890_s3 + $0xc] ss:$16 sps:$4 sm:$0xff]  }
 0x123   : > { %v710_v3 = vpop.f32.mrf.mxu0  ;;  %v833_v5 = vpop.f32.mrf.mxu1  ;;  %1923 = vmatprep.mubr.msk.bf16.mxu1 %vm1226_vm2, %v2282_v62 }
 0x124   : > { %v715_v4 = vmax.f32 %v592_v63, %v710_v3  ;;  %v851_v7 = vadd.f32 %v844_v61, %v837_v1 }
 0x125   : > { %v712_v6 = vpop.f32.mrf.mxu0  ;;  %v835_v9 = vpop.f32.mrf.mxu1 }
 0x126   : > { %v838_v8 = vmax.f32 %v715_v4, %v833_v5  ;;  %v853_v12 = vmax.f32 %v851_v7, 0.0 }
 0x128   : > { %v852_v11 = vadd.f32 %v849_v10, %v838_v8 }
 0x12a   : > { %v854_v13 = vmax.f32 %v852_v11, 0.0 }
 0x12c   : > { %v2123_v14 = vpack.i.bf16 %v854_v13, %v853_v12  ;;  %v2540_v15 = vpack.c.bf16 %v854_v13, %v853_v12 }
 0x12e   : > { %2124 = vrot.lane.b32.xlu0 %v2123_v14, %s2342_s23  ;;  %2114 = vrot.lane.b32.xlu1 %v2123_v14, %s2343_s24 }
 0x132   : > { %2134 = vrot.lane.b32.xlu0 %v2123_v14, %s2344_s25  ;;  %2119 = vrot.lane.b32.xlu1 %v2123_v14, %s2345_s26 }
 0x136   : > { %2144 = vrot.lane.b32.xlu0 %v2123_v14, %s2346_s27  ;;  %2129 = vrot.lane.b32.xlu1 %v2123_v14, %s2347_s28 }
 0x13a   : > { %2154 = vrot.lane.b32.xlu0 %v2123_v14, %s2348_s29  ;;  %2139 = vrot.lane.b32.xlu1 %v2123_v14, %s2349_s11 }
 0x13e   : > { %2159 = vrot.lane.b32.xlu0 %v2123_v14, %s2350_s12  ;;  %2149 = vrot.lane.b32.xlu1 %v2123_v14, %s2351_s13 }
 0x142   : > { %2164 = vrot.lane.b32.xlu0 %v2123_v14, %s2352_s14  ;;  %s1942_s14 = sshll.u32 %s2898_s10, 4 }
 0x146   : > { %2169 = vrot.lane.b32.xlu0 %v2123_v14, %s2353_s15 }
 0x14a   : > { %2174 = vrot.lane.b32.xlu0 %v2123_v14, %s2354_s16 }
 0x14e   : > { %2179 = vrot.lane.b32.xlu0 %v2123_v14, %s2355_s17 }
 0x152   : > { %2184 = vrot.lane.b32.xlu0 %v2123_v14, %s2356_s18 }
 0x156   : > { %2224 = vrot.lane.b32.xlu0 %v2123_v14, %s2357_s19 }
 0x1a0   : > { %v2125_v16 = vpop.permute.xlu0 %2124  ;;  %v2115_v17 = vpop.permute.xlu1 %2114 }
 0x1a1   : > { %v2117_v18 = vunpack.i.h.bf16 %v2115_v17  ;;  %v2116_v19 = vunpack.i.l.bf16 %v2115_v17  ;;  %2189 = vrot.lane.b32.xlu1 %v2115_v17, %s2357_s19  ;;  %v2127_v24 = vunpack.i.h.bf16 %v2125_v16  ;;  %v2126_v25 = vunpack.i.l.bf16 %v2125_v16  ;;  %v2279_v17 = vld [vmem:[%s2890_s3 + $0x24] ss:$16 sps:$4 sm:$0xff]  }
 0x1a3   : > { %v1008_v36 = vpack.c.bf16 %v2117_v18, %v2116_v19  ;;  %v1006_v52 = vpack.c.bf16 %v2127_v24, %v2126_v25  ;;  %v2281_v18 = vld [vmem:[%s2890_s3 + $0x20] ss:$16 sps:$4 sm:$0xff]   ;;  %v2285_v19 = vld [vmem:[%s2890_s3 + $0x44] ss:$16 sps:$4 sm:$0xff]  }
 0x1a4   : > { %v2543_v20 = vpop.permute.xlu0 %2134  ;;  %v2120_v21 = vpop.permute.xlu1 %2119  ;;  %v2303_v24 = vld [vmem:[%s2890_s3 + $0xa4] ss:$16 sps:$4 sm:$0xff]   ;;  %v2305_v25 = vld [vmem:[%s2890_s3 + $0xa0] ss:$16 sps:$4 sm:$0xff]  }
 0x1a5   : > { %v2122_v22 = vunpack.i.h.bf16 %v2120_v21  ;;  %v2121_v23 = vunpack.i.l.bf16 %v2120_v21  ;;  %2194 = vrot.lane.b32.xlu1 %v2120_v21, %s2357_s19  ;;  %v2137_v33 = vunpack.i.h.bf16 %v2543_v20  ;;  %v2136_v34 = vunpack.i.l.bf16 %v2543_v20  ;;  %v2293_v21 = vld [vmem:[%s2890_s3 + $0x60] ss:$16 sps:$4 sm:$0xff]  }
 0x1a7   : > { %v1007_v45 = vpack.c.bf16 %v2122_v22, %v2121_v23  ;;  %v1004_v3 = vpack.c.bf16 %v2137_v33, %v2136_v34  ;;  %v2297_v22 = vld [vmem:[%s2890_s3 + $0x84] ss:$16 sps:$4 sm:$0xff]   ;;  %v2299_v23 = vld [vmem:[%s2890_s3 + $0x80] ss:$16 sps:$4 sm:$0xff]  }
 0x1a8   : > { %v2546_v26 = vpop.permute.xlu0 %2144  ;;  %v2130_v27 = vpop.permute.xlu1 %2129 }
 0x1a9   : > { %v2132_v28 = vunpack.i.h.bf16 %v2130_v27  ;;  %v2131_v29 = vunpack.i.l.bf16 %v2130_v27  ;;  %2199 = vrot.lane.b32.xlu1 %v2125_v16, %s2357_s19  ;;  %v2147_v49 = vunpack.i.h.bf16 %v2546_v26  ;;  %v2146_v50 = vunpack.i.l.bf16 %v2546_v26  ;;  %v2276_v16 = vld [vmem:[%s2890_s3] ss:$16 sps:$4 sm:$0xff]  }
 0x1ab   : > { %v1005_v60 = vpack.c.bf16 %v2132_v28, %v2131_v29  ;;  %v1002_v13 = vpack.c.bf16 %v2147_v49, %v2146_v50  ;;  %v2315_v28 = vld [vmem:[%s2890_s3 + $0xe4] ss:$16 sps:$4 sm:$0xff]   ;;  %v2317_v29 = vld [vmem:[%s2890_s3 + $0xe0] ss:$16 sps:$4 sm:$0xff]  }
 0x1ac   : > { %v2155_v30 = vpop.permute.xlu0 %2154  ;;  %v2140_v37 = vpop.permute.xlu1 %2139 }
 0x1ad   : > { %v2157_v31 = vunpack.i.h.bf16 %v2155_v30  ;;  %v2156_v32 = vunpack.i.l.bf16 %v2155_v30  ;;  %2204 = vrot.lane.b32.xlu1 %v2130_v27, %s2357_s19  ;;  %v2142_v42 = vunpack.i.h.bf16 %v2140_v37  ;;  %v2141_v43 = vunpack.i.l.bf16 %v2140_v37  ;;  %v2311_v27 = vld [vmem:[%s2890_s3 + $0xc0] ss:$16 sps:$4 sm:$0xff]  }
 0x1af   : > { %v1016_v35 = vpack.c.bf16 %v2157_v31, %v2156_v32  ;;  %v1003_v8 = vpack.c.bf16 %v2142_v42, %v2141_v43 }
 0x1b0   : > { %v2160_v38 = vpop.permute.xlu0 %2159  ;;  %v2150_v53 = vpop.permute.xlu1 %2149 }
 0x1b1   : > { %v2162_v39 = vunpack.i.h.bf16 %v2160_v38  ;;  %v2161_v40 = vunpack.i.l.bf16 %v2160_v38  ;;  %1943 = vmatprep.subr.bf16.mxu0 %v1016_v35  ;;  %2209 = vrot.lane.b32.xlu1 %v2543_v20, %s2357_s19  ;;  %v2152_v57 = vunpack.i.h.bf16 %v2150_v53  ;;  %v2151_v58 = vunpack.i.l.bf16 %v2150_v53  ;;  %v2291_v20 = vld [vmem:[%s2890_s3 + $0x64] ss:$16 sps:$4 sm:$0xff]  }
 0x1b2   : > { %1944 = vmatpush3.bf16.msra.mxu0 %v1008_v36 }
 0x1b3   : > { %v1015_v44 = vpack.c.bf16 %v2162_v39, %v2161_v40  ;;  %v1009_v14 = vpack.c.bf16 %v2152_v57, %v2151_v58 }
 0x1b4   : > { %v2165_v46 = vpop.permute.xlu0 %2164 }
 0x1b5   : > { %v2167_v47 = vunpack.i.h.bf16 %v2165_v46  ;;  %v2166_v48 = vunpack.i.l.bf16 %v2165_v46  ;;  %1945 = vmatprep.subr.bf16.mxu0 %v1015_v44  ;;  %2214 = vrot.lane.b32.xlu1 %v2140_v37, %s2357_s19 }
 0x1b6   : > { %1946 = vmatpush3.bf16.msra.mxu0 %v1007_v45 }
 0x1b7   : > { %v1014_v51 = vpack.c.bf16 %v2167_v47, %v2166_v48 }
 0x1b8   : > { %v2170_v54 = vpop.permute.xlu0 %2169 }
 0x1b9   : > { %v2172_v55 = vunpack.i.h.bf16 %v2170_v54  ;;  %v2171_v56 = vunpack.i.l.bf16 %v2170_v54  ;;  %1947 = vmatprep.subr.bf16.mxu0 %v1014_v51  ;;  %2219 = vrot.lane.b32.xlu1 %v2546_v26, %s2357_s19  ;;  %v2309_v26 = vld [vmem:[%s2890_s3 + $0xc4] ss:$16 sps:$4 sm:$0xff]  }
 0x1ba   : > { %1948 = vmatpush3.bf16.msra.mxu0 %v1006_v52 }
 0x1bb   : > { %v1013_v59 = vpack.c.bf16 %v2172_v55, %v2171_v56 }
 0x1bc   : > { %v2175_v61 = vpop.permute.xlu0 %2174 }
 0x1bd   : > { %v2177_v63 = vunpack.i.h.bf16 %v2175_v61  ;;  %v2176_v1 = vunpack.i.l.bf16 %v2175_v61  ;;  %1949 = vmatprep.subr.bf16.mxu0 %v1013_v59  ;;  %2229 = vrot.lane.b32.xlu1 %v2150_v53, %s2357_s19  ;;  %s332_s19 = scalar_lea.vmem %s2896_s9, %s1942_s14 }
 0x1be   : > { %1950 = vmatpush3.bf16.msra.mxu0 %v1005_v60 }
 0x1bf   : > { %v1012_v2 = vpack.c.bf16 %v2177_v63, %v2176_v1 }
 0x1c0   : > { %v2180_v4 = vpop.permute.xlu0 %2179 }
 0x1c1   : > { %v2182_v5 = vunpack.i.h.bf16 %v2180_v4  ;;  %v2181_v6 = vunpack.i.l.bf16 %v2180_v4  ;;  %1951 = vmatprep.subr.bf16.mxu0 %v1012_v2  ;;  %v2288_v4 = vld [vmem:[%s2890_s3 + $0x2c] ss:$16 sps:$4 sm:$0xff]  }
 0x1c2   : > { %1952 = vmatpush3.bf16.msra.mxu0 %v1004_v3  ;;  %v2284_v3 = vld [vmem:[%s2890_s3 + $0x8] ss:$16 sps:$4 sm:$0xff]  }
 0x1c3   : > { %v1011_v7 = vpack.c.bf16 %v2182_v5, %v2181_v6  ;;  %v2290_v5 = vld [vmem:[%s2890_s3 + $0x28] ss:$16 sps:$4 sm:$0xff]  }
 0x1c4   : > { %v2185_v9 = vpop.permute.xlu0 %2184  ;;  %v2296_v6 = vld [vmem:[%s2890_s3 + $0x48] ss:$16 sps:$4 sm:$0xff]  }
 0x1c5   : > { %v2187_v10 = vunpack.i.h.bf16 %v2185_v9  ;;  %v2186_v11 = vunpack.i.l.bf16 %v2185_v9  ;;  %1953 = vmatprep.subr.bf16.mxu0 %v1011_v7  ;;  %v2300_v7 = vld [vmem:[%s2890_s3 + $0x6c] ss:$16 sps:$4 sm:$0xff]  }
 0x1c6   : > { %1954 = vmatpush3.bf16.msra.mxu0 %v1003_v8  ;;  %v2302_v8 = vld [vmem:[%s2890_s3 + $0x68] ss:$16 sps:$4 sm:$0xff]   ;;  %v2306_v9 = vld [vmem:[%s2890_s3 + $0x8c] ss:$16 sps:$4 sm:$0xff]  }
 0x1c7   : > { %v1010_v12 = vpack.c.bf16 %v2187_v10, %v2186_v11  ;;  %v2308_v10 = vld [vmem:[%s2890_s3 + $0x88] ss:$16 sps:$4 sm:$0xff]   ;;  %v2312_v11 = vld [vmem:[%s2890_s3 + $0xac] ss:$16 sps:$4 sm:$0xff]  }
 0x1c8   : > { %v2225_v54 = vpop.permute.xlu0 %2224 }
 0x1c9   : > { %1955 = vmatprep.subr.bf16.mxu0 %v1010_v12  ;;  %v2227_v58 = vunpack.i.h.bf16 %v2225_v54  ;;  %v2226_v59 = vunpack.i.l.bf16 %v2225_v54  ;;  %v2314_v12 = vld [vmem:[%s2890_s3 + $0xa8] ss:$16 sps:$4 sm:$0xff]  }
 0x1ca   : > { %1956 = vmatpush3.bf16.msra.mxu0 %v1002_v13  ;;  %v2318_v13 = vld [vmem:[%s2890_s3 + $0xcc] ss:$16 sps:$4 sm:$0xff]  }
 0x1cb   : > { %1957 = vmatprep.subr.bf16.mxu0 %v1009_v14  ;;  %v1017_v62 = vpack.c.bf16 %v2227_v58, %v2226_v59  ;;  %v2320_v14 = vld [vmem:[%s2890_s3 + $0xc8] ss:$16 sps:$4 sm:$0xff]  }
 0x1ce   : > { %1958 = vmatpush3.bf16.msra.mxu0 %v2540_v15  ;;  %v2287_v15 = vld [vmem:[%s2890_s3 + $0x40] ss:$16 sps:$4 sm:$0xff]  }
 0x1d1   : > { %1284 = vmatmul.mubr.bf16.vlgmr.msra.gmra.mxu0 %v2276_v16  ;;  %v2321_v16 = vld [vmem:[%s2890_s3 + $0xec] ss:$16 sps:$4 sm:$0xff]  }
 0x1d2   : > { %1291 = vmatprep.mubr.bf16.mxu0 %v2279_v17  ;;  %v2323_v17 = vld [vmem:[%s2890_s3 + $0xe8] ss:$16 sps:$4 sm:$0xff]  }
 0x1d9   : > { %1292 = vmatmul.mubr.bf16.gmra.mxu0 %v2281_v18 }
 0x1da   : > { %1299 = vmatprep.mubr.bf16.mxu0 %v2285_v19 }
 0x1e1   : > { %1300 = vmatmul.mubr.bf16.gmra.mxu0 %v2287_v15 }
 0x1e2   : > { %1307 = vmatprep.mubr.bf16.mxu0 %v2291_v20 }
 0x1e9   : > { %1308 = vmatmul.mubr.bf16.gmra.mxu0 %v2293_v21 }
 0x1ea   : > { %1315 = vmatprep.mubr.bf16.mxu0 %v2297_v22 }
 0x1f1   : > { %1316 = vmatmul.mubr.bf16.gmra.mxu0 %v2299_v23 }
 0x1f2   : > { %1323 = vmatprep.mubr.bf16.mxu0 %v2303_v24 }
 0x1f9   : > { %1324 = vmatmul.mubr.bf16.gmra.mxu0 %v2305_v25 }
 0x1fa   : > { %1331 = vmatprep.mubr.bf16.mxu0 %v2309_v26 }
 0x201   : > { %1332 = vmatmul.mubr.bf16.gmra.mxu0 %v2311_v27 }
 0x202   : > { %1339 = vmatprep.mubr.bf16.mxu0 %v2315_v28 }
 0x209   : > { %1340 = vmatmul.mubr.bf16.gmra.mxu0 %v2317_v29 }
 0x213   : > { %v2190_v30 = vpop.permute.xlu1 %2189 }
 0x214   : > { %v2192_v31 = vunpack.i.h.bf16 %v2190_v30  ;;  %v2191_v32 = vunpack.i.l.bf16 %v2190_v30 }
 0x216   : > { %v1024_v33 = vpack.c.bf16 %v2192_v31, %v2191_v32  ;;  %v2324_v32 = vld [vmem:[%s2892_s5] sm:$0xff]  }
 0x217   : > { %v2195_v34 = vpop.permute.xlu1 %2194  ;;  %2048 = vmatprep.mubr.bf16.mxu0 %v2324_v32 }
 0x218   : > { %v2197_v35 = vunpack.i.h.bf16 %v2195_v34  ;;  %v2196_v36 = vunpack.i.l.bf16 %v2195_v34  ;;  %1349 = vmatpush1.bf16.msra.mxu1 %v1024_v33 }
 0x219   : > { %1350 = vmatprep.subr.bf16.mxu1 %v2341_v0 }
 0x21a   : > { %v1023_v37 = vpack.c.bf16 %v2197_v35, %v2196_v36 }
 0x21b   : > { %v2200_v38 = vpop.permute.xlu1 %2199 }
 0x21c   : > { %v2202_v39 = vunpack.i.h.bf16 %v2200_v38  ;;  %v2201_v40 = vunpack.i.l.bf16 %v2200_v38  ;;  %1351 = vmatpush1.bf16.msra.mxu1 %v1023_v37 }
 0x21d   : > { %1352 = vmatprep.subr.bf16.mxu1 %v2341_v0 }
 0x21e   : > { %v1022_v41 = vpack.c.bf16 %v2202_v39, %v2201_v40  ;;  %v1058_v39 = vld [vmem:[%s2891_s4] sm:$0xff] }
 0x21f   : > { %v2205_v42 = vpop.permute.xlu1 %2204 }
 0x220   : > { %v2207_v43 = vunpack.i.h.bf16 %v2205_v42  ;;  %v2206_v44 = vunpack.i.l.bf16 %v2205_v42  ;;  %1353 = vmatpush1.bf16.msra.mxu1 %v1022_v41 }
 0x221   : > { %1354 = vmatprep.subr.bf16.mxu1 %v2341_v0 }
 0x222   : > { %v1021_v45 = vpack.c.bf16 %v2207_v43, %v2206_v44  ;;  %v1059_v43 = vld [vmem:[%s2891_s4 + $0x8] sm:$0xff] }
 0x223   : > { %v2210_v46 = vpop.permute.xlu1 %2209 }
 0x224   : > { %v2212_v47 = vunpack.i.h.bf16 %v2210_v46  ;;  %v2211_v48 = vunpack.i.l.bf16 %v2210_v46  ;;  %1355 = vmatpush1.bf16.msra.mxu1 %v1021_v45 }
 0x225   : > { %1356 = vmatprep.subr.bf16.mxu1 %v2341_v0 }
 0x226   : > { %v1020_v49 = vpack.c.bf16 %v2212_v47, %v2211_v48 }
 0x227   : > { %v2215_v50 = vpop.permute.xlu1 %2214 }
 0x228   : > { %v2217_v51 = vunpack.i.h.bf16 %v2215_v50  ;;  %v2216_v52 = vunpack.i.l.bf16 %v2215_v50  ;;  %1357 = vmatpush1.bf16.msra.mxu1 %v1020_v49  ;;  %v1060_v49 = vld [vmem:[%s2891_s4 + $0x10] sm:$0xff] }
 0x229   : > { %1358 = vmatprep.subr.bf16.mxu1 %v2341_v0 }
 0x22a   : > { %v1019_v53 = vpack.c.bf16 %v2217_v51, %v2216_v52 }
 0x22b   : > { %v2220_v55 = vpop.permute.xlu1 %2219 }
 0x22c   : > { %v2222_v56 = vunpack.i.h.bf16 %v2220_v55  ;;  %v2221_v57 = vunpack.i.l.bf16 %v2220_v55  ;;  %1359 = vmatpush1.bf16.msra.mxu1 %v1019_v53 }
 0x22d   : > { %1360 = vmatprep.subr.bf16.mxu1 %v2341_v0 }
 0x22e   : > { %v1018_v60 = vpack.c.bf16 %v2222_v56, %v2221_v57  ;;  %v1061_v57 = vld [vmem:[%s2891_s4 + $0x18] sm:$0xff] }
 0x22f   : > { %v2230_v61 = vpop.permute.xlu1 %2229 }
 0x230   : > { %1361 = vmatpush1.bf16.msra.mxu1 %v1018_v60  ;;  %v2232_v63 = vunpack.i.h.bf16 %v2230_v61  ;;  %v2231_v1 = vunpack.i.l.bf16 %v2230_v61 }
 0x231   : > { %1362 = vmatprep.subr.bf16.mxu1 %v2341_v0 }
 0x232   : > { %v1025_v2 = vpack.c.bf16 %v2232_v63, %v2231_v1 }
 0x234   : > { %1363 = vmatpush1.bf16.msra.mxu1 %v1017_v62 }
 0x235   : > { %1378 = vmatprep.subr.bf16.mxu1 %v2341_v0  ;;  %v2294_v0 = vld [vmem:[%s2890_s3 + $0x4c] ss:$16 sps:$4 sm:$0xff]  }
 0x238   : > { %1379 = vmatpush2.bf16.msra.mxu1 %v1025_v2 }
 0x23b   : > { %1381 = vmatmul.mubr.bf16.vlgmr.msra.gmra.mxu1 %v2284_v3 }
 0x23c   : > { %1924 = vmatprep.mubr.msk.bf16.mxu1 %vm1226_vm2, %v2288_v4 }
 0x243   : > { %1389 = vmatmul.mubr.bf16.gmra.mxu1 %v2290_v5 }
 0x244   : > { %1925 = vmatprep.mubr.msk.bf16.mxu1 %vm1226_vm2, %v2294_v0 }
 0x24b   : > { %1397 = vmatmul.mubr.bf16.gmra.mxu1 %v2296_v6 }
 0x24c   : > { %1926 = vmatprep.mubr.msk.bf16.mxu1 %vm1226_vm2, %v2300_v7 }
 0x253   : > { %1405 = vmatmul.mubr.bf16.gmra.mxu1 %v2302_v8 }
 0x254   : > { %1927 = vmatprep.mubr.msk.bf16.mxu1 %vm1226_vm2, %v2306_v9 }
 0x25b   : > { %1413 = vmatmul.mubr.bf16.gmra.mxu1 %v2308_v10 }
 0x25c   : > { %1928 = vmatprep.mubr.msk.bf16.mxu1 %vm1226_vm2, %v2312_v11 }
 0x263   : > { %1421 = vmatmul.mubr.bf16.gmra.mxu1 %v2314_v12 }
 0x264   : > { %1929 = vmatprep.mubr.msk.bf16.mxu1 %vm1226_vm2, %v2318_v13 }
 0x26b   : > { %1429 = vmatmul.mubr.bf16.gmra.mxu1 %v2320_v14 }
 0x26c   : > { %1930 = vmatprep.mubr.msk.bf16.mxu1 %vm1226_vm2, %v2321_v16 }
 0x273   : > { %1437 = vmatmul.mubr.bf16.gmra.mxu1 %v2323_v17 }
 0x291   : > { %v1959_v18 = vpop.f32.mrf.mxu0 }
 0x293   : > { %v1960_v19 = vpop.f32.mrf.mxu0 }
 0x294   : > { %v1961_v15 = vadd.f32 %v1960_v19, %v1959_v18 }
 0x295   : > { %v1962_v20 = vpop.f32.mrf.mxu0 }
 0x296   : > { %v1286_v41 = vadd.f32 %v1961_v15, %v1058_v39 }
 0x297   : > { %v1963_v21 = vpop.f32.mrf.mxu0 }
 0x298   : > { %v1964_v22 = vadd.f32 %v1963_v21, %v1962_v20 }
 0x299   : > { %v1965_v23 = vpop.f32.mrf.mxu0 }
 0x29a   : > { %v1289_v47 = vadd.f32 %v1964_v22, %v1059_v43 }
 0x29b   : > { %v1966_v24 = vpop.f32.mrf.mxu0 }
 0x29c   : > { %v1967_v25 = vadd.f32 %v1966_v24, %v1965_v23 }
 0x29d   : > { %v1968_v26 = vpop.f32.mrf.mxu0 }
 0x29e   : > { %v1294_v55 = vadd.f32 %v1967_v25, %v1060_v49 }
 0x29f   : > { %v1969_v27 = vpop.f32.mrf.mxu0 }
 0x2a0   : > { %v1970_v28 = vadd.f32 %v1969_v27, %v1968_v26 }
 0x2a1   : > { %v2674_v29 = vpop.f32.mrf.mxu0 }
 0x2a2   : > { %v1297_v62 = vadd.f32 %v1970_v28, %v1061_v57 }
 0x2a3   : > { %v2676_v30 = vpop.f32.mrf.mxu0 }
 0x2a5   : > { %v2678_v31 = vpop.f32.mrf.mxu0 }
 0x2a7   : > { %v2683_v33 = vpop.f32.mrf.mxu0 }
 0x2a9   : > { %v2685_v34 = vpop.f32.mrf.mxu0 }
 0x2ab   : > { %v2687_v35 = vpop.f32.mrf.mxu0 }
 0x2ad   : > { %v2689_v36 = vpop.f32.mrf.mxu0 }
 0x2af   : > { %v2691_v37 = vpop.f32.mrf.mxu0 }
 0x2b1   : > { %v2693_v38 = vpop.f32.mrf.mxu0 }
 0x2b3   : > { %v2698_v40 = vpop.f32.mrf.mxu0 }
 0x2b5   : > { %v2703_v44 = vpop.f32.mrf.mxu0 }
 0x2b7   : > { %v2708_v50 = vpop.f32.mrf.mxu0 }
 0x2b9   : > { %v1989_v58 = vpop.f32.mrf.mxu0 }
 0x2bb   : > { %v1990_v1 = vpop.f32.mrf.mxu0 }
 0x2bd   : > { %v1992_v6 = vpop.f32.mrf.mxu0 }
 0x2bf   : > { %v1993_v10 = vpop.f32.mrf.mxu0 }
 0x2c0   : > { %v1994_v57 = vadd.f32 %v1993_v10, %v1992_v6  ;;  %v1988_v6 = vadd.f32 %v2708_v50, %v2703_v44  ;;  %v1066_v44 = vld [vmem:[%s2891_s4 + $0x40] sm:$0xff] }
 0x2c1   : > { %v1995_v13 = vpop.f32.mrf.mxu0 }
 0x2c3   : > { %v1996_v17 = vpop.f32.mrf.mxu0 }
 0x2c5   : > { %v1998_v15 = vpop.f32.mrf.mxu0 }
 0x2c7   : > { %v1999_v22 = vpop.f32.mrf.mxu0 }
 0x2c9   : > { %v2001_v25 = vpop.f32.mrf.mxu0 }
 0x2cb   : > { %v2002_v28 = vpop.f32.mrf.mxu0 }
 0x2cd   : > { %v2004_v39 = vpop.f32.mrf.mxu0 }
 0x2cf   : > { %v2005_v43 = vpop.f32.mrf.mxu0 }
 0x2fb   : > { %v1382_v42 = vpop.f32.mrf.mxu1 }
 0x2fc   : > { %v1383_v45 = vadd.f32 %v1382_v42, %v1286_v41 }
 0x2fd   : > { %v1384_v46 = vpop.f32.mrf.mxu1 }
 0x2fe   : > { %v1445_v53 = vmax.f32 %v1383_v45, 0.0  ;;  %v2000_v46 = vadd.f32 %v1999_v22, %v1998_v15 }
 0x2ff   : > { %v1385_v48 = vpop.f32.mrf.mxu1 }
 0x300   : > { %v1386_v51 = vadd.f32 %v1385_v48, %v1289_v47  ;;  %v2003_v47 = vadd.f32 %v2002_v28, %v2001_v25  ;;  %v1071_v48 = vld [vmem:[%s2891_s4 + $0x68] sm:$0xff] }
 0x301   : > { %v1387_v52 = vpop.f32.mrf.mxu1 }
 0x302   : > { %v1446_v54 = vmax.f32 %v1386_v51, 0.0  ;;  %v1072_v51 = vld [vmem:[%s2891_s4 + $0x70] sm:$0xff]  ;;  %v1997_v52 = vadd.f32 %v1996_v17, %v1995_v13  ;;  %v1067_v17 = vld [vmem:[%s2891_s4 + $0x48] sm:$0xff] }
 0x303   : > { %v1390_v56 = vpop.f32.mrf.mxu1  ;;  %v1321_v50 = vadd.f32 %v1988_v6, %v1067_v17  ;;  %v1499_v17 = vld [vmem:[%s2893_s6 + $0x70] sm:$0xff] }
 0x304   : > { %v2713_v59 = vpack.c.bf16 %v1446_v54, %v1445_v53  ;;  %v1391_v60 = vadd.f32 %v1390_v56, %v1294_v55  ;;  %v2006_v53 = vadd.f32 %v2005_v43, %v2004_v39  ;;  %v1070_v54 = vld [vmem:[%s2891_s4 + $0x60] sm:$0xff]  ;;  %v1073_v56 = vld [vmem:[%s2891_s4 + $0x78] sm:$0xff] }
 0x305   : > { %v1392_v61 = vpop.f32.mrf.mxu1 }
 0x306   : > { %v1447_v4 = vmax.f32 %v1391_v60, 0.0  ;;  %v1337_v60 = vadd.f32 %v2000_v46, %v1071_v48  ;;  %v1342_v61 = vadd.f32 %v2003_v47, %v1072_v51 }
 0x307   : > { %v1393_v63 = vpop.f32.mrf.mxu1 }
 0x308   : > { %v1394_v2 = vadd.f32 %v1393_v63, %v1297_v62  ;;  %v1991_v62 = vadd.f32 %v1990_v1, %v1989_v58  ;;  %v1069_v63 = vld [vmem:[%s2891_s4 + $0x58] sm:$0xff]  ;;  %v1985_v1 = vadd.f32 %v2698_v40, %v2693_v38 }
 0x309   : > { %v1395_v3 = vpop.f32.mrf.mxu1  ;;  %v1329_v10 = vadd.f32 %v1994_v57, %v1069_v63  ;;  %v2358_v63 = vmov 0.0  }
 0x30a   : > { %v1448_v5 = vmax.f32 %v1394_v2, 0.0  ;;  %v1068_v3 = vld [vmem:[%s2891_s4 + $0x50] sm:$0xff]  ;;  %v1318_v39 = vadd.f32 %v1985_v1, %v1066_v44  ;;  %2064 = vmatprep.subr.bf16.mxu1 %v2358_v63  ;;  %2080 = vmatprep.mubr.msk.bf16.mxu1 %vm2359_vm3, %v2358_v63 }
 0x30b   : > { %v2715_v0 = vpop.f32.mrf.mxu1 }
 0x30c   : > { %v2717_v7 = vpack.c.bf16 %v1448_v5, %v1447_v4  ;;  %v1334_v4 = vadd.f32 %v1997_v52, %v1070_v54 }
 0x30d   : > { %v1400_v8 = vpop.f32.mrf.mxu1 }
 0x30f   : > { %v2719_v9 = vpop.f32.mrf.mxu1 }
 0x311   : > { %v1403_v11 = vpop.f32.mrf.mxu1 }
 0x312   : > { %v1345_v11 = vadd.f32 %v2006_v53, %v1073_v56 }
 0x313   : > { %v2721_v12 = vpop.f32.mrf.mxu1 }
 0x315   : > { %v1408_v14 = vpop.f32.mrf.mxu1 }
 0x317   : > { %v2723_v16 = vpop.f32.mrf.mxu1 }
 0x319   : > { %v1411_v18 = vpop.f32.mrf.mxu1 }
 0x31a   : > { %v1326_v18 = vadd.f32 %v1991_v62, %v1068_v3  ;;  %v2331_v62 = vld [vmem:[%s2892_s5 + $0x38] sm:$0xff]  }
 0x31b   : > { %v2725_v19 = vpop.f32.mrf.mxu1 }
 0x31d   : > { %v1416_v20 = vpop.f32.mrf.mxu1 }
 0x31f   : > { %v1417_v21 = vpop.f32.mrf.mxu1 }
 0x321   : > { %v1419_v23 = vpop.f32.mrf.mxu1 }
 0x323   : > { %v1422_v24 = vpop.f32.mrf.mxu1 }
 0x324   : > { %v1423_v28 = vadd.f32 %v1422_v24, %v1326_v18 }
 0x325   : > { %v1424_v26 = vpop.f32.mrf.mxu1 }
 0x326   : > { %v1982_v26 = vadd.f32 %v2691_v37, %v2689_v36  ;;  %v1064_v36 = vld [vmem:[%s2891_s4 + $0x30] sm:$0xff]  ;;  %v1976_v37 = vadd.f32 %v2683_v33, %v2678_v31  ;;  %v1062_v31 = vld [vmem:[%s2891_s4 + $0x20] sm:$0xff] }
 0x327   : > { %v1425_v27 = vpop.f32.mrf.mxu1 }
 0x328   : > { %v1426_v20 = vadd.f32 %v1425_v27, %v1329_v10  ;;  %v1065_v27 = vld [vmem:[%s2891_s4 + $0x38] sm:$0xff] }
 0x329   : > { %v1427_v32 = vpop.f32.mrf.mxu1  ;;  %v1313_v24 = vadd.f32 %v1982_v26, %v1065_v27  ;;  %v1498_v26 = vld [vmem:[%s2893_s6 + $0x68] sm:$0xff] }
 0x32a   : > { %v1979_v32 = vadd.f32 %v2687_v35, %v2685_v34  ;;  %v1415_v34 = vadd.f32 %v2725_v19, %v1318_v39  ;;  %v1455_v35 = vmax.f32 %v1423_v28, 0.0  ;;  %v1495_v39 = vld [vmem:[%s2893_s6 + $0x50] sm:$0xff] }
 0x32b   : > { %v1430_v41 = vpop.f32.mrf.mxu1  ;;  %v1410_v47 = vadd.f32 %v2723_v16, %v1313_v24 }
 0x32c   : > { %v1431_v14 = vadd.f32 %v1430_v41, %v1334_v4  ;;  %v1418_v41 = vadd.f32 %v1417_v21, %v1321_v50  ;;  %v1063_v21 = vld [vmem:[%s2891_s4 + $0x28] sm:$0xff]  ;;  %v1310_v46 = vadd.f32 %v1979_v32, %v1064_v36  ;;  %v1453_v51 = vmax.f32 %v1415_v34, 0.0  ;;  %v1496_v50 = vld [vmem:[%s2893_s6 + $0x58] sm:$0xff]  ;;  %v1493_v34 = vld [vmem:[%s2893_s6 + $0x40] sm:$0xff] }
 0x32d   : > { %v1432_v42 = vpop.f32.mrf.mxu1  ;;  %v1305_v33 = vadd.f32 %v1976_v37, %v1063_v21  ;;  %v1452_v52 = vmax.f32 %v1410_v47, 0.0  ;;  %v1494_v36 = vld [vmem:[%s2893_s6 + $0x48] sm:$0xff] }
 0x32e   : > { %v1457_v38 = vmax.f32 %v1431_v14, 0.0  ;;  %v1456_v42 = vmax.f32 %v1426_v20, 0.0  ;;  %v1454_v48 = vmax.f32 %v1418_v41, 0.0  ;;  %v1407_v19 = vadd.f32 %v2721_v12, %v1310_v46  ;;  %v2327_v12 = vld [vmem:[%s2892_s5 + $0x18] sm:$0xff]  }
 0x32f   : > { %v1433_v45 = vpop.f32.mrf.mxu1  ;;  %v1500_v20 = vld [vmem:[%s2893_s6 + $0x78] sm:$0xff] }
 0x330   : > { %v1434_v5 = vadd.f32 %v1433_v45, %v1337_v60  ;;  %v1973_v45 = vadd.f32 %v2676_v30, %v2674_v29  ;;  %v1402_v30 = vadd.f32 %v2719_v9, %v1305_v33  ;;  %v1465_v53 = vpack.c.bf16 %v1454_v48, %v1453_v51  ;;  %v2326_v9 = vld [vmem:[%s2892_s5 + $0x10] sm:$0xff]   ;;  %v1492_v46 = vld [vmem:[%s2893_s6 + $0x38] sm:$0xff]  ;;  %v1490_v51 = vld [vmem:[%s2893_s6 + $0x28] sm:$0xff] }
 0x331   : > { %v1435_v49 = vpop.f32.mrf.mxu1  ;;  %v1451_v54 = vmax.f32 %v1407_v19, 0.0 }
 0x332   : > { %v1458_v22 = vmax.f32 %v1434_v5, 0.0  ;;  %v1466_v49 = vpack.c.bf16 %v1456_v42, %v1455_v35  ;;  %v1302_v29 = vadd.f32 %v1973_v45, %v1062_v31 }
 0x333   : > { %v1438_v55 = vpop.f32.mrf.mxu1  ;;  %v1464_v56 = vpack.c.bf16 %v1452_v52, %v1451_v54  ;;  %v1489_v52 = vld [vmem:[%s2893_s6 + $0x20] sm:$0xff] }
 0x334   : > { %v1439_v8 = vadd.f32 %v1438_v55, %v1342_v61  ;;  %v1467_v43 = vpack.c.bf16 %v1458_v22, %v1457_v38  ;;  %v1399_v16 = vadd.f32 %v2715_v0, %v1302_v29  ;;  %v1450_v55 = vmax.f32 %v1402_v30, 0.0  ;;  %v2325_v0 = vld [vmem:[%s2892_s5 + $0x8] sm:$0xff]   ;;  %v2330_v61 = vld [vmem:[%s2892_s5 + $0x30] sm:$0xff]  }
 0x335   : > { %v1440_v2 = vpop.f32.mrf.mxu1 }
 0x336   : > { %v1459_v23 = vmax.f32 %v1439_v8, 0.0  ;;  %v1449_v57 = vmax.f32 %v1399_v16, 0.0 }
 0x337   : > { %v1441_v13 = vpop.f32.mrf.mxu1 }
 0x338   : > { %v1442_v58 = vadd.f32 %v1441_v13, %v1345_v11  ;;  %v1463_v60 = vpack.c.bf16 %v1450_v55, %v1449_v57  ;;  %v1488_v55 = vld [vmem:[%s2893_s6 + $0x18] sm:$0xff] }
 0x339   : > { %v1443_v15 = vpop.f32.mrf.mxu1 }
 0x33a   : > { %v1460_v25 = vmax.f32 %v1442_v58, 0.0 }
 0x33c   : > { %v1468_v40 = vpack.c.bf16 %v1460_v25, %v1459_v23  ;;  %v1497_v23 = vld [vmem:[%s2893_s6 + $0x60] sm:$0xff] }
 0x33e   : > { %2032 = vmatprep.subr.bf16.mxu0 %v1468_v40 }
 0x33f   : > { %2033 = vmatpush3.bf16.msra.mxu0 %v1468_v40 }
 0x340   : > { %2034 = vmatprep.subr.bf16.mxu0 %v1467_v43 }
 0x343   : > { %2035 = vmatpush3.bf16.msra.mxu0 %v1467_v43 }
 0x344   : > { %2036 = vmatprep.subr.bf16.mxu0 %v1466_v49 }
 0x347   : > { %2037 = vmatpush3.bf16.msra.mxu0 %v1466_v49  ;;  %v1491_v49 = vld [vmem:[%s2893_s6 + $0x30] sm:$0xff] }
 0x348   : > { %2038 = vmatprep.subr.bf16.mxu0 %v1465_v53 }
 0x34b   : > { %2039 = vmatpush3.bf16.msra.mxu0 %v1465_v53 }
 0x34c   : > { %2040 = vmatprep.subr.bf16.mxu0 %v1464_v56 }
 0x34f   : > { %2041 = vmatpush3.bf16.msra.mxu0 %v1464_v56 }
 0x350   : > { %2042 = vmatprep.subr.bf16.mxu0 %v1463_v60 }
 0x353   : > { %2043 = vmatpush3.bf16.msra.mxu0 %v1463_v60  ;;  %v1487_v60 = vld [vmem:[%s2893_s6 + $0x10] sm:$0xff] }
 0x354   : > { %2044 = vmatprep.subr.bf16.mxu0 %v2717_v7 }
 0x357   : > { %2045 = vmatpush3.bf16.msra.mxu0 %v2717_v7  ;;  %v2328_v7 = vld [vmem:[%s2892_s5 + $0x20] sm:$0xff]  }
 0x358   : > { %2046 = vmatprep.subr.bf16.mxu0 %v2713_v59 }
 0x35b   : > { %2047 = vmatpush3.bf16.msra.mxu0 %v2713_v59  ;;  %v2329_v59 = vld [vmem:[%s2892_s5 + $0x28] sm:$0xff]  }
 0x35e   : > { %2049 = vmatmul.mubr.bf16.vlgmr.msra.gmra.mxu0 %v2325_v0 }
 0x35f   : > { %2052 = vmatprep.mubr.bf16.mxu0 %v2326_v9 }
 0x366   : > { %2053 = vmatmul.mubr.bf16.gmra.mxu0 %v2327_v12 }
 0x367   : > { %2056 = vmatprep.mubr.bf16.mxu0 %v2328_v7  ;;  %v1486_v7 = vld [vmem:[%s2893_s6 + $0x8] sm:$0xff] }
 0x36e   : > { %2057 = vmatmul.mubr.bf16.gmra.mxu0 %v2329_v59 }
 0x36f   : > { %2060 = vmatprep.mubr.bf16.mxu0 %v2330_v61 }
 0x376   : > { %2061 = vmatmul.mubr.bf16.gmra.mxu0 %v2331_v62  ;;  %v1485_v62 = vld [vmem:[%s2893_s6] sm:$0xff] }
 0x41e   : > { %v2807_v2 = vpop.f32.mrf.mxu0 }
 0x41f   : > { %v1592_v59 = vadd.f32 %v2807_v2, %v1487_v60 }
 0x420   : > { %v2809_v3 = vpop.f32.mrf.mxu0 }
 0x422   : > { %v2051_v4 = vpop.f32.mrf.mxu0 }
 0x423   : > { %v1595_v0 = vadd.f32 %v2051_v4, %v1488_v55 }
 0x424   : > { %v2811_v5 = vpop.f32.mrf.mxu0 }
 0x425   : > { %v1587_v4 = vadd.f32 %v2811_v5, %v1486_v7 }
 0x426   : > { %v2054_v8 = vpop.f32.mrf.mxu0 }
 0x427   : > { %v1608_v29 = vadd.f32 %v2054_v8, %v1491_v49  ;;  %v1649_v8 = vmax.f32 %v1595_v0, 0.0 }
 0x428   : > { %v1599_v11 = vpop.f32.mrf.mxu0 }
 0x429   : > { %v1652_v56 = vmax.f32 %v1608_v29, 0.0  ;;  %v1600_v57 = vadd.f32 %v1599_v11, %v1489_v52 }
 0x42a   : > { %v2055_v13 = vpop.f32.mrf.mxu0 }
 0x42b   : > { %v1611_v31 = vadd.f32 %v2055_v13, %v1492_v46  ;;  %v1650_v61 = vmax.f32 %v1600_v57, 0.0  ;;  %v1648_v13 = vmax.f32 %v1592_v59, 0.0 }
 0x42c   : > { %v1602_v6 = vpop.f32.mrf.mxu0 }
 0x42d   : > { %v1653_v53 = vmax.f32 %v1611_v31, 0.0  ;;  %v1603_v16 = vadd.f32 %v1602_v6, %v1490_v51  ;;  %v1584_v6 = vadd.f32 %v2809_v3, %v1485_v62  ;;  %v1663_v2 = vpack.c.bf16 %v1649_v8, %v1648_v13  ;;  %v1672_v3 = vld [vmem:[%s2895_s8] sm:$0xff] }
 0x42e   : > { %v2058_v10 = vpop.f32.mrf.mxu0 }
 0x42f   : > { %v1624_v37 = vadd.f32 %v2058_v10, %v1495_v39  ;;  %v1665_v9 = vpack.c.bf16 %v1653_v53, %v1652_v56  ;;  %v1651_v12 = vmax.f32 %v1603_v16, 0.0  ;;  %v1647_v10 = vmax.f32 %v1587_v4, 0.0 }
 0x430   : > { %v1615_v14 = vpop.f32.mrf.mxu0 }
 0x431   : > { %v1656_v47 = vmax.f32 %v1624_v37, 0.0  ;;  %v1616_v48 = vadd.f32 %v1615_v14, %v1493_v34  ;;  %v1664_v11 = vpack.c.bf16 %v1651_v12, %v1650_v61  ;;  %v1646_v14 = vmax.f32 %v1584_v6, 0.0 }
 0x432   : > { %v2059_v58 = vpop.f32.mrf.mxu0 }
 0x433   : > { %v1627_v41 = vadd.f32 %v2059_v58, %v1496_v50  ;;  %v1654_v30 = vmax.f32 %v1616_v48, 0.0  ;;  %v1662_v58 = vpack.c.bf16 %v1647_v10, %v1646_v14 }
 0x434   : > { %v1618_v1 = vpop.f32.mrf.mxu0 }
 0x435   : > { %v1657_v35 = vmax.f32 %v1627_v41, 0.0  ;;  %v1619_v45 = vadd.f32 %v1618_v1, %v1494_v36  ;;  %v2332_v1 = vld [vmem:[%s2894_s7] sm:$0x1f]  }
 0x436   : > { %v2062_v18 = vpop.f32.mrf.mxu0 }
 0x437   : > { %v1640_v22 = vadd.f32 %v2062_v18, %v1499_v17  ;;  %v1667_v33 = vpack.c.bf16 %v1657_v35, %v1656_v47  ;;  %v1655_v19 = vmax.f32 %v1619_v45, 0.0  ;;  %v1673_v18 = vld [vmem:[%s2895_s8 + $0x8] sm:$0x3] }
 0x438   : > { %v1631_v15 = vpop.f32.mrf.mxu0 }
 0x439   : > { %v1660_v38 = vmax.f32 %v1640_v22, 0.0  ;;  %v1632_v40 = vadd.f32 %v1631_v15, %v1497_v23  ;;  %v1666_v54 = vpack.c.bf16 %v1655_v19, %v1654_v30 }
 0x43a   : > { %v2063_v25 = vpop.f32.mrf.mxu0 }
 0x43b   : > { %v1643_v44 = vadd.f32 %v2063_v25, %v1500_v20  ;;  %v1658_v24 = vmax.f32 %v1632_v40, 0.0 }
 0x43c   : > { %v1634_v28 = vpop.f32.mrf.mxu0 }
 0x43d   : > { %v1661_v32 = vmax.f32 %v1643_v44, 0.0  ;;  %v1635_v27 = vadd.f32 %v1634_v28, %v1498_v26 }
 0x43f   : > { %v1669_v42 = vpack.c.bf16 %v1661_v32, %v1660_v38  ;;  %v1659_v43 = vmax.f32 %v1635_v27, 0.0 }
 0x441   : > { %2065 = vmatpush3.bf16.msra.mxu1 %v1669_v42  ;;  %v1668_v21 = vpack.c.bf16 %v1659_v43, %v1658_v24 }
 0x442   : > { %2066 = vmatprep.subr.bf16.mxu1 %v2358_v63 }
 0x445   : > { %2067 = vmatpush3.bf16.msra.mxu1 %v1668_v21 }
 0x446   : > { %2068 = vmatprep.subr.bf16.mxu1 %v2358_v63 }
 0x449   : > { %2069 = vmatpush3.bf16.msra.mxu1 %v1667_v33 }
 0x44a   : > { %2070 = vmatprep.subr.bf16.mxu1 %v2358_v63 }
 0x44d   : > { %2071 = vmatpush3.bf16.msra.mxu1 %v1666_v54 }
 0x44e   : > { %2072 = vmatprep.subr.bf16.mxu1 %v2358_v63 }
 0x451   : > { %2073 = vmatpush3.bf16.msra.mxu1 %v1665_v9 }
 0x452   : > { %2074 = vmatprep.subr.bf16.mxu1 %v2358_v63 }
 0x455   : > { %2075 = vmatpush3.bf16.msra.mxu1 %v1664_v11 }
 0x456   : > { %2076 = vmatprep.subr.bf16.mxu1 %v2358_v63 }
 0x459   : > { %2077 = vmatpush3.bf16.msra.mxu1 %v1663_v2 }
 0x45a   : > { %2078 = vmatprep.subr.bf16.mxu1 %v2358_v63 }
 0x45d   : > { %2079 = vmatpush3.bf16.msra.mxu1 %v1662_v58 }
 0x460   : > { %2081 = vmatmul.mubr.bf16.vlgmr.msra.gmra.mxu1 %v2332_v1 }
 0x520   : > { %v1714_v5 = vpop.f32.mrf.mxu1 }
 0x521   : > { %v1715_v17 = vadd.f32 %v1714_v5, %v1672_v3 }
 0x522   : > { %v2082_v63 = vpop.f32.mrf.mxu1 }
 0x523   : > { %1722 = vst.msk [vmem:[%s332_s19] sm:$0xff] %vm1721_vm4, %v1715_v17 }
 0x524   : > { %v1717_v15 = vpop.f32.mrf.mxu1 }
 0x525   : > { %v1718_v20 = vadd.f32 %v1717_v15, %v1673_v18 }
 0x526   : > { %v2083_v22 = vpop.f32.mrf.mxu1 }
 0x527   : > { %1724 = vst.msk [vmem:[%s332_s19 + $0x8] sm:$0x3] %vm1723_vm5, %v1718_v20 }
 0x528 PF: > { %s19_s30 = sadd.s32 1, %s2339_s30  }
 0x529   : > { %p16_p4 = scmp.ge.s32.totalorder %s19_s30, 4  }
 0x52b   :  { %18 = sbr.rel (!%p16_p4) target bundleno = 1 (0x1), region = 89 }

</bundles_post_ra>
